<compile_context>
chip_gen: v6e
topology: v6e:2x2x1
jax: 0.10.0
libtpu: 0.0.40
codegen_flags: <defaults>
</compile_context>

<pallas_src>
import jax
import jax.numpy as jnp
from jax.experimental import pallas as pl
from jax.experimental.pallas import tpu as pltpu


def _round_up(v, m):
    return (v + m - 1) // m * m


def neognn_kernel(adj_ref, rhs_ref, xrow_ref, selfgcn_ref, xr_ref,
                  dinv_ref, invdeg_ref, adst_ref, asrc_ref, xtbf_ref,
                  wl_ref, w1_ref, w2_ref, b1_ref, bsum_ref, o_ref):
    tm, coutp = o_ref.shape
    adj_bf = adj_ref[...]                          # (TM, Np) bf16 edge counts, [dst, src]
    npad = adj_bf.shape[1]

    # ---- single fused adjacency matmul: adj @ [dinv*(x@Wgcn) | x] (bf16 MXU) ----
    agg = jnp.dot(adj_bf, rhs_ref[...], preferred_element_type=jnp.float32)
    agg_gcn = agg[:, :coutp]                       # sum_j a_ij dinv_j (x_j W_gcn)
    sum_agg = agg[:, coutp:]                       # sum_j a_ij x_j   (SAGE mean + GIN)

    dinv_row = dinv_ref[...]                       # (TM, 1)  1/sqrt(deg_in + 1)
    invdeg_row = invdeg_ref[...]                   # (TM, 1)  1/max(deg_in, 1)  (exact)

    # ---- GCNConv: dinv_i * agg + dinv_i^2 * (x_i W_gcn)  (self term precomputed) ----
    x_gcn = dinv_row * agg_gcn + selfgcn_ref[...]

    # ---- SAGEConv (mean aggr): W_l mean_j(x_j) + W_r x ------------------------------
    x_sage = jnp.dot(sum_agg * invdeg_row, wl_ref[...],
                     preferred_element_type=jnp.float32) + xr_ref[...]

    # ---- GINConv (eps=0): MLP(x + sum_j x_j) ----------------------------------------
    g = xrow_ref[...] + sum_agg
    g = jnp.maximum(jnp.dot(g, w1_ref[...], preferred_element_type=jnp.float32)
                    + b1_ref[...], 0.0)
    x_gin = jnp.dot(g, w2_ref[...], preferred_element_type=jnp.float32)

    # ---- GATConv (1 head, concat=False); a_src / a_dst precomputed in wrapper -------
    e = adst_ref[...] + asrc_ref[...]              # (TM,1) + (1,Np) -> (TM,Np)
    e = jnp.where(e > 0, e, 0.2 * e)               # leaky_relu(0.2)
    col_ids = jax.lax.broadcasted_iota(jnp.int32, (tm, npad), 1)
    row_ids = pl.program_id(0) * tm + jax.lax.broadcasted_iota(jnp.int32, (tm, 1), 0)
    # Input edge list carries no self loops, so diag(adj)=0 and "+1" adds exactly one.
    cnt = adj_bf.astype(jnp.float32) + (col_ids == row_ids).astype(jnp.float32)
    logits = jnp.where(cnt > 0, e, jnp.float32(-1e30))
    logits = logits - jnp.max(logits, axis=1, keepdims=True)
    p = jnp.exp(logits) * cnt                      # duplicate edges weighted by count
    alpha = p * pl.reciprocal(jnp.sum(p, axis=1, keepdims=True), approx=True)
    x_gat = jnp.dot(alpha.astype(jnp.bfloat16), xtbf_ref[...],
                    preferred_element_type=jnp.float32)

    out = x_gcn + x_sage + x_gin + x_gat + bsum_ref[...]
    o_ref[...] = jnp.maximum(out, 0.0).astype(o_ref.dtype)


def neognn_forward(x, edge_index, params):
    """x: [N, Cin] f32, edge_index: [2, E] int32 (row 0 = src, row 1 = dst)."""
    n, cin = x.shape
    cout = params["wgcn"].shape[1]
    coutp = _round_up(cout, 128)                   # lane-dense output / intermediates
    npad = max(_round_up(n, 128), 128)             # lane-dense adj slab / contraction
    tm = 128 if npad >= 256 else 64                # >=2 row steps so both v7x TCs work

    # ---- glue + node-invariant precompute (plain XLA, once per layer) ----------------
    src, dst = edge_index[0], edge_index[1]
    adj = jnp.zeros((npad, npad), jnp.float32).at[dst, src].add(1.0)   # adj[target, source]
    adj_bf = adj.astype(jnp.bfloat16)              # small edge counts exact in bf16
    deg = jnp.sum(adj, axis=1, keepdims=True)      # in-degree (no self loops)
    dinv = jax.lax.rsqrt(deg + 1.0)                # GCN degree incl. added self loop
    invdeg = 1.0 / jnp.maximum(deg, 1.0)           # exact SAGE mean divisor

    xp = jnp.zeros((npad, cin), jnp.float32).at[:n, :].set(x)

    pad_o = lambda a: jnp.pad(a, ((0, 0), (0, coutp - cout)))
    wgcn, wl, wr = pad_o(params["wgcn"]), pad_o(params["wl"]), pad_o(params["wr"])
    w1, wgat = pad_o(params["w1"]), pad_o(params["wgat"])
    w2 = jnp.pad(params["w2"], ((0, coutp - cout), (0, coutp - cout)))
    b1 = pad_o(params["b1"])
    asrc, adst = pad_o(params["asrc"]), pad_o(params["adst"])
    # All output-side biases add at the end -> fold into one.
    bsum = pad_o(params["bgcn"] + params["bl"] + params["b2"] + params["bgat"])

    h_gcn = jnp.dot(xp, wgcn)                      # x @ W_gcn  (all nodes, f32)
    xt = jnp.dot(xp, wgat)                         # x @ W_gat
    xr_proj = jnp.dot(xp, wr)                      # x @ W_r
    self_gcn = (dinv * dinv) * h_gcn               # GCN self-loop term dinv_i^2 h_i
    rhs_agg = jnp.concatenate([dinv * h_gcn, xp], axis=1).astype(jnp.bfloat16)
    xt_bf = xt.astype(jnp.bfloat16)
    a_src = jnp.sum(xt * asrc, axis=1).reshape(1, npad)        # (1, Np) lane-major
    a_dst = jnp.sum(xt * adst, axis=1, keepdims=True)          # (Np, 1), row-tiled

    args = (adj_bf, rhs_agg, xp, self_gcn, xr_proj, dinv, invdeg, a_dst,
            a_src, xt_bf, wl, w1, w2, b1, bsum)

    def call(single_buffer_consts):
        if single_buffer_consts:
            cst = lambda s: pl.BlockSpec(s, lambda i: (0, 0),
                                         pipeline_mode=pl.Buffered(1))
        else:
            cst = lambda s: pl.BlockSpec(s, lambda i: (0, 0))
        row = lambda s: pl.BlockSpec(s, lambda i: (i, 0))
        in_specs = [
            row((tm, npad)),             # adj slab (destination rows)         bf16
            cst((npad, coutp + cin)),    # [dinv*(x@Wgcn) | x]                 bf16
            row((tm, cin)),              # x rows (GIN self term)
            row((tm, coutp)),            # dinv^2 * (x@Wgcn) rows
            row((tm, coutp)),            # x @ W_r rows
            row((tm, 1)),                # dinv rows
            row((tm, 1)),                # 1/max(deg,1) rows
            row((tm, 1)),                # GAT a_dst rows
            cst((1, npad)),              # GAT a_src (lane-major)
            cst((npad, coutp)),          # x @ W_gat                           bf16
            cst((cin, coutp)),           # wl
            cst((cin, coutp)),           # w1
            cst((coutp, coutp)),         # w2
            cst((1, coutp)),             # b1
            cst((1, coutp)),             # bsum
        ]
        out = pl.pallas_call(
            neognn_kernel,
            out_shape=jax.ShapeDtypeStruct((npad, coutp), jnp.float32),
            grid=(npad // tm,),
            in_specs=in_specs,
            out_specs=row((tm, coutp)),
            compiler_params=pltpu.CompilerParams(
                dimension_semantics=("parallel",),
                vmem_limit_bytes=48 * 1024 * 1024),   # headroom on v7x's 64 MiB VMEM
        )(*args)
        return jax.block_until_ready(out)

    try:
        out = call(True)       # single-buffer the index-invariant constant blocks
    except Exception:          # pl.Buffered(1) unsupported on this jax -> default path
        out = call(False)
    return out[:n, :cout]


def neognn_reference(x, edge_index, params):
    """Pure-JAX f32 reference mirroring the PyG semantics (for correctness check)."""
    n = x.shape[0]
    src, dst = edge_index[0], edge_index[1]
    adj = jnp.zeros((n, n), jnp.float32).at[dst, src].add(1.0)
    eye = jnp.eye(n, dtype=jnp.float32)

    # GCN
    adj_sl = adj + eye
    deg = adj_sl.sum(axis=1, keepdims=True)
    dinv = 1.0 / jnp.sqrt(deg)
    x_gcn = (dinv * adj_sl * dinv.T) @ (x @ params["wgcn"]) + params["bgcn"]

    # SAGE (mean)
    deg_in = adj.sum(axis=1, keepdims=True)
    mean_agg = (adj @ x) / jnp.maximum(deg_in, 1.0)
    x_sage = mean_agg @ params["wl"] + params["bl"] + x @ params["wr"]

    # GIN
    g = x + adj @ x
    g = jnp.maximum(g @ params["w1"] + params["b1"], 0.0)
    x_gin = g @ params["w2"] + params["b2"]

    # GAT
    xt = x @ params["wgat"]
    a_src = jnp.sum(xt * params["asrc"], axis=1, keepdims=True)
    a_dst = jnp.sum(xt * params["adst"], axis=1, keepdims=True)
    e = a_dst + a_src.T
    e = jnp.where(e > 0, e, 0.2 * e)
    cnt = jnp.where(eye > 0, 1.0, adj)
    logits = jnp.where(cnt > 0, e, -jnp.inf)
    p = jnp.exp(logits - jnp.max(logits, axis=1, keepdims=True)) * cnt
    alpha = p / p.sum(axis=1, keepdims=True)
    x_gat = alpha @ xt + params["bgat"]

    return jnp.maximum(x_gcn + x_sage + x_gin + x_gat, 0.0)


def init_params(key, cin, cout):
    ks = jax.random.split(key, 12)
    s = 0.1
    return {
        # GCNConv
        "wgcn": s * jax.random.normal(ks[0], (cin, cout), jnp.float32),
        "bgcn": s * jax.random.normal(ks[1], (1, cout), jnp.float32),
        # SAGEConv (lin_l has bias, lin_r has no bias)
        "wl": s * jax.random.normal(ks[2], (cin, cout), jnp.float32),
        "bl": s * jax.random.normal(ks[3], (1, cout), jnp.float32),
        "wr": s * jax.random.normal(ks[4], (cin, cout), jnp.float32),
        # GINConv MLP: Linear(cin,cout) -> ReLU -> Linear(cout,cout)
        "w1": s * jax.random.normal(ks[5], (cin, cout), jnp.float32),
        "b1": s * jax.random.normal(ks[6], (1, cout), jnp.float32),
        "w2": s * jax.random.normal(ks[7], (cout, cout), jnp.float32),
        "b2": s * jax.random.normal(ks[8], (1, cout), jnp.float32),
        # GATConv (1 head): lin (no bias), att_src, att_dst, bias
        "wgat": s * jax.random.normal(ks[9], (cin, cout), jnp.float32),
        "asrc": s * jax.random.normal(ks[10], (1, cout), jnp.float32),
        "adst": s * jax.random.normal(ks[11], (1, cout), jnp.float32),
        "bgat": jnp.zeros((1, cout), jnp.float32),
    }


if __name__ == "__main__":
    N, CIN, COUT = 16, 8, 32
    key = jax.random.PRNGKey(0)
    kx, kp = jax.random.split(key)

    x = jax.random.normal(kx, (N, CIN), jnp.float32)

    # Deterministic edge set: ring edges i->(i+1)%N and i->(i+2)%N (no self loops).
    nodes = jnp.arange(N, dtype=jnp.int32)
    src = jnp.concatenate([nodes, nodes])
    dst = jnp.concatenate([(nodes + 1) % N, (nodes + 2) % N])
    edge_index = jnp.stack([src, dst], axis=0)            # [2, 32]

    params = init_params(kp, CIN, COUT)

    out = neognn_forward(x, edge_index, params)
    out = jax.block_until_ready(out)
    ref = neognn_reference(x, edge_index, params)

    assert out.shape == (N, COUT) and out.dtype == jnp.float32
    assert bool(jnp.all(out >= 0.0))                      # post-ReLU
    assert bool(jnp.all(jnp.isfinite(out)))
    err = float(jnp.max(jnp.abs(out - ref)))
    assert err < 5e-2, f"max abs error vs f32 reference: {err}"
    print("KERNEL_OK")
</pallas_src>

<mosaic_0001>
module attributes {stable_mosaic.version = 11 : i64} {
  func.func @neognn_kernel(%arg0: i32, %arg1: memref<64x128xbf16, #tpu.memory_space<vmem>>, %arg2: memref<128x136xbf16, #tpu.memory_space<vmem>>, %arg3: memref<64x8xf32, #tpu.memory_space<vmem>>, %arg4: memref<64x128xf32, #tpu.memory_space<vmem>>, %arg5: memref<64x128xf32, #tpu.memory_space<vmem>>, %arg6: memref<64x1xf32, #tpu.memory_space<vmem>>, %arg7: memref<64x1xf32, #tpu.memory_space<vmem>>, %arg8: memref<64x1xf32, #tpu.memory_space<vmem>>, %arg9: memref<1x128xf32, #tpu.memory_space<vmem>>, %arg10: memref<128x128xbf16, #tpu.memory_space<vmem>>, %arg11: memref<8x128xf32, #tpu.memory_space<vmem>>, %arg12: memref<8x128xf32, #tpu.memory_space<vmem>>, %arg13: memref<128x128xf32, #tpu.memory_space<vmem>>, %arg14: memref<1x128xf32, #tpu.memory_space<vmem>>, %arg15: memref<1x128xf32, #tpu.memory_space<vmem>>, %arg16: memref<64x128xf32, #tpu.memory_space<vmem>>) attributes {dimension_semantics = [#tpu.dimension_semantics<parallel>], iteration_bounds = array<i64: 2>, scalar_prefetch = 0 : i64, scratch_operands = 0 : i64, tpu.core_type = #tpu.core_type<tc>, window_params = [{transform_indices = @transform_0, window_bounds = array<i64: 64, 128>}, {pipeline_mode = #tpu.pipeline_mode<synchronous>, transform_indices = @transform_1, window_bounds = array<i64: 128, 136>}, {transform_indices = @transform_2, window_bounds = array<i64: 64, 8>}, {transform_indices = @transform_3, window_bounds = array<i64: 64, 128>}, {transform_indices = @transform_4, window_bounds = array<i64: 64, 128>}, {transform_indices = @transform_5, window_bounds = array<i64: 64, 1>}, {transform_indices = @transform_6, window_bounds = array<i64: 64, 1>}, {transform_indices = @transform_7, window_bounds = array<i64: 64, 1>}, {pipeline_mode = #tpu.pipeline_mode<synchronous>, transform_indices = @transform_8, window_bounds = array<i64: 1, 128>}, {pipeline_mode = #tpu.pipeline_mode<synchronous>, transform_indices = @transform_9, window_bounds = array<i64: 128, 128>}, {pipeline_mode = #tpu.pipeline_mode<synchronous>, transform_indices = @transform_10, window_bounds = array<i64: 8, 128>}, {pipeline_mode = #tpu.pipeline_mode<synchronous>, transform_indices = @transform_11, window_bounds = array<i64: 8, 128>}, {pipeline_mode = #tpu.pipeline_mode<synchronous>, transform_indices = @transform_12, window_bounds = array<i64: 128, 128>}, {pipeline_mode = #tpu.pipeline_mode<synchronous>, transform_indices = @transform_13, window_bounds = array<i64: 1, 128>}, {pipeline_mode = #tpu.pipeline_mode<synchronous>, transform_indices = @transform_14, window_bounds = array<i64: 1, 128>}, {transform_indices = @transform_15, window_bounds = array<i64: 64, 128>}]} {
    %c0 = arith.constant 0 : index
    %c0_0 = arith.constant 0 : index
    %0 = vector.load %arg1[%c0, %c0_0] : memref<64x128xbf16, #tpu.memory_space<vmem>>, vector<64x128xbf16>
    %c0_1 = arith.constant 0 : index
    %c0_2 = arith.constant 0 : index
    %1 = vector.load %arg2[%c0_1, %c0_2] : memref<128x136xbf16, #tpu.memory_space<vmem>>, vector<128x136xbf16>
    %cst = arith.constant dense<0.000000e+00> : vector<64x136xf32>
    %2 = tpu.matmul %0, %1, %cst {dimension_numbers = #tpu.dot_dimension_numbers<[1], [0], [0], [1], [0, 0, 1, 1], [], []>} : vector<64x128xbf16>, vector<128x136xbf16>, vector<64x136xf32> -> vector<64x136xf32>
    %3 = vector.extract_strided_slice %2 {offsets = [0, 0], sizes = [64, 128], strides = [1, 1]} : vector<64x136xf32> to vector<64x128xf32>
    %4 = vector.extract_strided_slice %2 {offsets = [0, 128], sizes = [64, 8], strides = [1, 1]} : vector<64x136xf32> to vector<64x8xf32>
    %c0_3 = arith.constant 0 : index
    %c0_4 = arith.constant 0 : index
    %5 = vector.load %arg6[%c0_3, %c0_4] : memref<64x1xf32, #tpu.memory_space<vmem>>, vector<64x1xf32>
    %c0_5 = arith.constant 0 : index
    %c0_6 = arith.constant 0 : index
    %6 = vector.load %arg7[%c0_5, %c0_6] : memref<64x1xf32, #tpu.memory_space<vmem>>, vector<64x1xf32>
    %7 = vector.broadcast %5 : vector<64x1xf32> to vector<64x128xf32>
    %8 = arith.mulf %7, %3 : vector<64x128xf32>
    %c0_7 = arith.constant 0 : index
    %c0_8 = arith.constant 0 : index
    %9 = vector.load %arg4[%c0_7, %c0_8] : memref<64x128xf32, #tpu.memory_space<vmem>>, vector<64x128xf32>
    %10 = arith.addf %8, %9 : vector<64x128xf32>
    %11 = vector.broadcast %6 : vector<64x1xf32> to vector<64x8xf32>
    %12 = arith.mulf %4, %11 : vector<64x8xf32>
    %c0_9 = arith.constant 0 : index
    %c0_10 = arith.constant 0 : index
    %13 = vector.load %arg11[%c0_9, %c0_10] : memref<8x128xf32, #tpu.memory_space<vmem>>, vector<8x128xf32>
    %cst_11 = arith.constant dense<0.000000e+00> : vector<64x128xf32>
    %14 = tpu.matmul %12, %13, %cst_11 {dimension_numbers = #tpu.dot_dimension_numbers<[1], [0], [0], [1], [0, 0, 1, 1], [], []>} : vector<64x8xf32>, vector<8x128xf32>, vector<64x128xf32> -> vector<64x128xf32>
    %c0_12 = arith.constant 0 : index
    %c0_13 = arith.constant 0 : index
    %15 = vector.load %arg5[%c0_12, %c0_13] : memref<64x128xf32, #tpu.memory_space<vmem>>, vector<64x128xf32>
    %16 = arith.addf %14, %15 : vector<64x128xf32>
    %c0_14 = arith.constant 0 : index
    %c0_15 = arith.constant 0 : index
    %17 = vector.load %arg3[%c0_14, %c0_15] : memref<64x8xf32, #tpu.memory_space<vmem>>, vector<64x8xf32>
    %18 = arith.addf %17, %4 : vector<64x8xf32>
    %c0_16 = arith.constant 0 : index
    %c0_17 = arith.constant 0 : index
    %19 = vector.load %arg12[%c0_16, %c0_17] : memref<8x128xf32, #tpu.memory_space<vmem>>, vector<8x128xf32>
    %cst_18 = arith.constant dense<0.000000e+00> : vector<64x128xf32>
    %20 = tpu.matmul %18, %19, %cst_18 {dimension_numbers = #tpu.dot_dimension_numbers<[1], [0], [0], [1], [0, 0, 1, 1], [], []>} : vector<64x8xf32>, vector<8x128xf32>, vector<64x128xf32> -> vector<64x128xf32>
    %c0_19 = arith.constant 0 : index
    %c0_20 = arith.constant 0 : index
    %21 = vector.load %arg14[%c0_19, %c0_20] : memref<1x128xf32, #tpu.memory_space<vmem>>, vector<1x128xf32>
    %22 = vector.broadcast %21 : vector<1x128xf32> to vector<64x128xf32>
    %23 = arith.addf %20, %22 : vector<64x128xf32>
    %cst_21 = arith.constant 0.000000e+00 : f32
    %24 = vector.broadcast %cst_21 : f32 to vector<64x128xf32>
    %25 = arith.maximumf %23, %24 : vector<64x128xf32>
    %c0_22 = arith.constant 0 : index
    %c0_23 = arith.constant 0 : index
    %26 = vector.load %arg13[%c0_22, %c0_23] : memref<128x128xf32, #tpu.memory_space<vmem>>, vector<128x128xf32>
    %cst_24 = arith.constant dense<0.000000e+00> : vector<64x128xf32>
    %27 = tpu.matmul %25, %26, %cst_24 {dimension_numbers = #tpu.dot_dimension_numbers<[1], [0], [0], [1], [0, 0, 1, 1], [], []>} : vector<64x128xf32>, vector<128x128xf32>, vector<64x128xf32> -> vector<64x128xf32>
    %c0_25 = arith.constant 0 : index
    %c0_26 = arith.constant 0 : index
    %28 = vector.load %arg8[%c0_25, %c0_26] : memref<64x1xf32, #tpu.memory_space<vmem>>, vector<64x1xf32>
    %c0_27 = arith.constant 0 : index
    %c0_28 = arith.constant 0 : index
    %29 = vector.load %arg9[%c0_27, %c0_28] : memref<1x128xf32, #tpu.memory_space<vmem>>, vector<1x128xf32>
    %30 = vector.broadcast %28 : vector<64x1xf32> to vector<64x128xf32>
    %31 = vector.broadcast %29 : vector<1x128xf32> to vector<64x128xf32>
    %32 = arith.addf %30, %31 : vector<64x128xf32>
    %cst_29 = arith.constant 0.000000e+00 : f32
    %33 = vector.broadcast %cst_29 : f32 to vector<64x128xf32>
    %34 = arith.cmpf ogt, %32, %33 : vector<64x128xf32>
    %cst_30 = arith.constant 2.000000e-01 : f32
    %35 = vector.broadcast %cst_30 : f32 to vector<64x128xf32>
    %36 = arith.mulf %35, %32 : vector<64x128xf32>
    %37 = arith.select %34, %32, %36 : vector<64x128xi1>, vector<64x128xf32>
    %38 = tpu.iota {dimensions = array<i32: 1>} : vector<64x128xi32>
    %c64_i32 = arith.constant 64 : i32
    %39 = arith.muli %arg0, %c64_i32 : i32
    %40 = tpu.iota {dimensions = array<i32: 0>} : vector<64x1xi32>
    %41 = vector.broadcast %39 : i32 to vector<64x1xi32>
    %42 = arith.addi %41, %40 : vector<64x1xi32>
    %43 = arith.extf %0 : vector<64x128xbf16> to vector<64x128xf32>
    %44 = vector.broadcast %42 : vector<64x1xi32> to vector<64x128xi32>
    %45 = arith.cmpi eq, %38, %44 : vector<64x128xi32>
    %46 = arith.extui %45 : vector<64x128xi1> to vector<64x128xi32>
    %47 = arith.sitofp %46 : vector<64x128xi32> to vector<64x128xf32>
    %48 = arith.addf %43, %47 : vector<64x128xf32>
    %cst_31 = arith.constant 0.000000e+00 : f32
    %49 = vector.broadcast %cst_31 : f32 to vector<64x128xf32>
    %50 = arith.cmpf ogt, %48, %49 : vector<64x128xf32>
    %cst_32 = arith.constant -1.000000e+30 : f32
    %51 = vector.broadcast %cst_32 : f32 to vector<64x128xf32>
    %52 = arith.select %50, %37, %51 : vector<64x128xi1>, vector<64x128xf32>
    %cst_33 = arith.constant dense<0xFF800000> : vector<64xf32>
    %53 = vector.multi_reduction <maximumf>, %52, %cst_33 [1] : vector<64x128xf32> to vector<64xf32>
    %54 = vector.shape_cast %53 : vector<64xf32> to vector<64x1xf32>
    %55 = vector.broadcast %54 : vector<64x1xf32> to vector<64x128xf32>
    %56 = arith.subf %52, %55 : vector<64x128xf32>
    %57 = math.exp %56 : vector<64x128xf32>
    %58 = arith.mulf %57, %48 : vector<64x128xf32>
    %cst_34 = arith.constant dense<0.000000e+00> : vector<64xf32>
    %59 = vector.multi_reduction <add>, %58, %cst_34 [1] : vector<64x128xf32> to vector<64xf32>
    %60 = vector.shape_cast %59 : vector<64xf32> to vector<64x1xf32>
    %61 = tpu.reciprocal %60 {approx = true} : vector<64x1xf32> -> vector<64x1xf32>
    %62 = vector.broadcast %61 : vector<64x1xf32> to vector<64x128xf32>
    %63 = arith.mulf %58, %62 : vector<64x128xf32>
    %64 = arith.truncf %63 : vector<64x128xf32> to vector<64x128xbf16>
    %c0_35 = arith.constant 0 : index
    %c0_36 = arith.constant 0 : index
    %65 = vector.load %arg10[%c0_35, %c0_36] : memref<128x128xbf16, #tpu.memory_space<vmem>>, vector<128x128xbf16>
    %cst_37 = arith.constant dense<0.000000e+00> : vector<64x128xf32>
    %66 = tpu.matmul %64, %65, %cst_37 {dimension_numbers = #tpu.dot_dimension_numbers<[1], [0], [0], [1], [0, 0, 1, 1], [], []>} : vector<64x128xbf16>, vector<128x128xbf16>, vector<64x128xf32> -> vector<64x128xf32>
    %67 = arith.addf %10, %16 : vector<64x128xf32>
    %68 = arith.addf %67, %27 : vector<64x128xf32>
    %69 = arith.addf %68, %66 : vector<64x128xf32>
    %c0_38 = arith.constant 0 : index
    %c0_39 = arith.constant 0 : index
    %70 = vector.load %arg15[%c0_38, %c0_39] : memref<1x128xf32, #tpu.memory_space<vmem>>, vector<1x128xf32>
    %71 = vector.broadcast %70 : vector<1x128xf32> to vector<64x128xf32>
    %72 = arith.addf %69, %71 : vector<64x128xf32>
    %cst_40 = arith.constant 0.000000e+00 : f32
    %73 = vector.broadcast %cst_40 : f32 to vector<64x128xf32>
    %74 = arith.maximumf %72, %73 : vector<64x128xf32>
    %c0_41 = arith.constant 0 : index
    %c0_42 = arith.constant 0 : index
    %75 = vector.load %arg16[%c0_41, %c0_42] : memref<64x128xf32, #tpu.memory_space<vmem>>, vector<64x128xf32>
    tpu.vector_store %arg16[%c0_41, %c0_42], %74 {strides = array<i32>} : memref<64x128xf32, #tpu.memory_space<vmem>>, vector<64x128xf32>,
    return
  }
  func.func @transform_0(%arg0: i32) -> (i32, i32) {
    %c0_i32 = arith.constant 0 : i32
    %c0_i32_0 = arith.constant 0 : i32
    return %arg0, %c0_i32 : i32, i32
  }
  func.func @transform_1(%arg0: i32) -> (i32, i32) {
    %c0_i32 = arith.constant 0 : i32
    %c0_i32_0 = arith.constant 0 : i32
    %c0_i32_1 = arith.constant 0 : i32
    return %c0_i32, %c0_i32_0 : i32, i32
  }
  func.func @transform_2(%arg0: i32) -> (i32, i32) {
    %c0_i32 = arith.constant 0 : i32
    %c0_i32_0 = arith.constant 0 : i32
    return %arg0, %c0_i32 : i32, i32
  }
  func.func @transform_3(%arg0: i32) -> (i32, i32) {
    %c0_i32 = arith.constant 0 : i32
    %c0_i32_0 = arith.constant 0 : i32
    return %arg0, %c0_i32 : i32, i32
  }
  func.func @transform_4(%arg0: i32) -> (i32, i32) {
    %c0_i32 = arith.constant 0 : i32
    %c0_i32_0 = arith.constant 0 : i32
    return %arg0, %c0_i32 : i32, i32
  }
  func.func @transform_5(%arg0: i32) -> (i32, i32) {
    %c0_i32 = arith.constant 0 : i32
    %c0_i32_0 = arith.constant 0 : i32
    return %arg0, %c0_i32 : i32, i32
  }
  func.func @transform_6(%arg0: i32) -> (i32, i32) {
    %c0_i32 = arith.constant 0 : i32
    %c0_i32_0 = arith.constant 0 : i32
    return %arg0, %c0_i32 : i32, i32
  }
  func.func @transform_7(%arg0: i32) -> (i32, i32) {
    %c0_i32 = arith.constant 0 : i32
    %c0_i32_0 = arith.constant 0 : i32
    return %arg0, %c0_i32 : i32, i32
  }
  func.func @transform_8(%arg0: i32) -> (i32, i32) {
    %c0_i32 = arith.constant 0 : i32
    %c0_i32_0 = arith.constant 0 : i32
    %c0_i32_1 = arith.constant 0 : i32
    return %c0_i32, %c0_i32_0 : i32, i32
  }
  func.func @transform_9(%arg0: i32) -> (i32, i32) {
    %c0_i32 = arith.constant 0 : i32
    %c0_i32_0 = arith.constant 0 : i32
    %c0_i32_1 = arith.constant 0 : i32
    return %c0_i32, %c0_i32_0 : i32, i32
  }
  func.func @transform_10(%arg0: i32) -> (i32, i32) {
    %c0_i32 = arith.constant 0 : i32
    %c0_i32_0 = arith.constant 0 : i32
    %c0_i32_1 = arith.constant 0 : i32
    return %c0_i32, %c0_i32_0 : i32, i32
  }
  func.func @transform_11(%arg0: i32) -> (i32, i32) {
    %c0_i32 = arith.constant 0 : i32
    %c0_i32_0 = arith.constant 0 : i32
    %c0_i32_1 = arith.constant 0 : i32
    return %c0_i32, %c0_i32_0 : i32, i32
  }
  func.func @transform_12(%arg0: i32) -> (i32, i32) {
    %c0_i32 = arith.constant 0 : i32
    %c0_i32_0 = arith.constant 0 : i32
    %c0_i32_1 = arith.constant 0 : i32
    return %c0_i32, %c0_i32_0 : i32, i32
  }
  func.func @transform_13(%arg0: i32) -> (i32, i32) {
    %c0_i32 = arith.constant 0 : i32
    %c0_i32_0 = arith.constant 0 : i32
    %c0_i32_1 = arith.constant 0 : i32
    return %c0_i32, %c0_i32_0 : i32, i32
  }
  func.func @transform_14(%arg0: i32) -> (i32, i32) {
    %c0_i32 = arith.constant 0 : i32
    %c0_i32_0 = arith.constant 0 : i32
    %c0_i32_1 = arith.constant 0 : i32
    return %c0_i32, %c0_i32_0 : i32, i32
  }
  func.func @transform_15(%arg0: i32) -> (i32, i32) {
    %c0_i32 = arith.constant 0 : i32
    %c0_i32_0 = arith.constant 0 : i32
    return %arg0, %c0_i32 : i32, i32
  }
}

module attributes {stable_mosaic.version = 11 : i64} {
  func.func @neognn_kernel(%arg0: i32, %arg1: memref<64x128xbf16, #tpu.memory_space<vmem>>, %arg2: memref<128x136xbf16, #tpu.memory_space<vmem>>, %arg3: memref<64x8xf32, #tpu.memory_space<vmem>>, %arg4: memref<64x128xf32, #tpu.memory_space<vmem>>, %arg5: memref<64x128xf32, #tpu.memory_space<vmem>>, %arg6: memref<64x1xf32, #tpu.memory_space<vmem>>, %arg7: memref<64x1xf32, #tpu.memory_space<vmem>>, %arg8: memref<64x1xf32, #tpu.memory_space<vmem>>, %arg9: memref<1x128xf32, #tpu.memory_space<vmem>>, %arg10: memref<128x128xbf16, #tpu.memory_space<vmem>>, %arg11: memref<8x128xf32, #tpu.memory_space<vmem>>, %arg12: memref<8x128xf32, #tpu.memory_space<vmem>>, %arg13: memref<128x128xf32, #tpu.memory_space<vmem>>, %arg14: memref<1x128xf32, #tpu.memory_space<vmem>>, %arg15: memref<1x128xf32, #tpu.memory_space<vmem>>, %arg16: memref<64x128xf32, #tpu.memory_space<vmem>>) attributes {dimension_semantics = [#tpu.dimension_semantics<parallel>], iteration_bounds = array<i64: 2>, scalar_prefetch = 0 : i64, scratch_operands = 0 : i64, tpu.core_type = #tpu.core_type<tc>, window_params = [{transform_indices = @transform_0, window_bounds = array<i64: 64, 128>}, {pipeline_mode = #tpu.pipeline_mode<synchronous>, transform_indices = @transform_1, window_bounds = array<i64: 128, 136>}, {transform_indices = @transform_2, window_bounds = array<i64: 64, 8>}, {transform_indices = @transform_3, window_bounds = array<i64: 64, 128>}, {transform_indices = @transform_4, window_bounds = array<i64: 64, 128>}, {transform_indices = @transform_5, window_bounds = array<i64: 64, 1>}, {transform_indices = @transform_6, window_bounds = array<i64: 64, 1>}, {transform_indices = @transform_7, window_bounds = array<i64: 64, 1>}, {pipeline_mode = #tpu.pipeline_mode<synchronous>, transform_indices = @transform_8, window_bounds = array<i64: 1, 128>}, {pipeline_mode = #tpu.pipeline_mode<synchronous>, transform_indices = @transform_9, window_bounds = array<i64: 128, 128>}, {pipeline_mode = #tpu.pipeline_mode<synchronous>, transform_indices = @transform_10, window_bounds = array<i64: 8, 128>}, {pipeline_mode = #tpu.pipeline_mode<synchronous>, transform_indices = @transform_11, window_bounds = array<i64: 8, 128>}, {pipeline_mode = #tpu.pipeline_mode<synchronous>, transform_indices = @transform_12, window_bounds = array<i64: 128, 128>}, {pipeline_mode = #tpu.pipeline_mode<synchronous>, transform_indices = @transform_13, window_bounds = array<i64: 1, 128>}, {pipeline_mode = #tpu.pipeline_mode<synchronous>, transform_indices = @transform_14, window_bounds = array<i64: 1, 128>}, {transform_indices = @transform_15, window_bounds = array<i64: 64, 128>}]} {
    %c0 = arith.constant 0 : index
    %c0_0 = arith.constant 0 : index
    %0 = vector.load %arg1[%c0, %c0_0] : memref<64x128xbf16, #tpu.memory_space<vmem>>, vector<64x128xbf16>
    %c0_1 = arith.constant 0 : index
    %c0_2 = arith.constant 0 : index
    %1 = vector.load %arg2[%c0_1, %c0_2] : memref<128x136xbf16, #tpu.memory_space<vmem>>, vector<128x136xbf16>
    %cst = arith.constant dense<0.000000e+00> : vector<64x136xf32>
    %2 = tpu.matmul %0, %1, %cst {dimension_numbers = #tpu.dot_dimension_numbers<[1], [0], [0], [1], [0, 0, 1, 1], [], []>} : vector<64x128xbf16>, vector<128x136xbf16>, vector<64x136xf32> -> vector<64x136xf32>
    %3 = vector.extract_strided_slice %2 {offsets = [0, 0], sizes = [64, 128], strides = [1, 1]} : vector<64x136xf32> to vector<64x128xf32>
    %4 = vector.extract_strided_slice %2 {offsets = [0, 128], sizes = [64, 8], strides = [1, 1]} : vector<64x136xf32> to vector<64x8xf32>
    %c0_3 = arith.constant 0 : index
    %c0_4 = arith.constant 0 : index
    %5 = vector.load %arg6[%c0_3, %c0_4] : memref<64x1xf32, #tpu.memory_space<vmem>>, vector<64x1xf32>
    %c0_5 = arith.constant 0 : index
    %c0_6 = arith.constant 0 : index
    %6 = vector.load %arg7[%c0_5, %c0_6] : memref<64x1xf32, #tpu.memory_space<vmem>>, vector<64x1xf32>
    %7 = vector.broadcast %5 : vector<64x1xf32> to vector<64x128xf32>
    %8 = arith.mulf %7, %3 : vector<64x128xf32>
    %c0_7 = arith.constant 0 : index
    %c0_8 = arith.constant 0 : index
    %9 = vector.load %arg4[%c0_7, %c0_8] : memref<64x128xf32, #tpu.memory_space<vmem>>, vector<64x128xf32>
    %10 = arith.addf %8, %9 : vector<64x128xf32>
    %11 = vector.broadcast %6 : vector<64x1xf32> to vector<64x8xf32>
    %12 = arith.mulf %4, %11 : vector<64x8xf32>
    %c0_9 = arith.constant 0 : index
    %c0_10 = arith.constant 0 : index
    %13 = vector.load %arg11[%c0_9, %c0_10] : memref<8x128xf32, #tpu.memory_space<vmem>>, vector<8x128xf32>
    %cst_11 = arith.constant dense<0.000000e+00> : vector<64x128xf32>
    %14 = tpu.matmul %12, %13, %cst_11 {dimension_numbers = #tpu.dot_dimension_numbers<[1], [0], [0], [1], [0, 0, 1, 1], [], []>} : vector<64x8xf32>, vector<8x128xf32>, vector<64x128xf32> -> vector<64x128xf32>
    %c0_12 = arith.constant 0 : index
    %c0_13 = arith.constant 0 : index
    %15 = vector.load %arg5[%c0_12, %c0_13] : memref<64x128xf32, #tpu.memory_space<vmem>>, vector<64x128xf32>
    %16 = arith.addf %14, %15 : vector<64x128xf32>
    %c0_14 = arith.constant 0 : index
    %c0_15 = arith.constant 0 : index
    %17 = vector.load %arg3[%c0_14, %c0_15] : memref<64x8xf32, #tpu.memory_space<vmem>>, vector<64x8xf32>
    %18 = arith.addf %17, %4 : vector<64x8xf32>
    %c0_16 = arith.constant 0 : index
    %c0_17 = arith.constant 0 : index
    %19 = vector.load %arg12[%c0_16, %c0_17] : memref<8x128xf32, #tpu.memory_space<vmem>>, vector<8x128xf32>
    %cst_18 = arith.constant dense<0.000000e+00> : vector<64x128xf32>
    %20 = tpu.matmul %18, %19, %cst_18 {dimension_numbers = #tpu.dot_dimension_numbers<[1], [0], [0], [1], [0, 0, 1, 1], [], []>} : vector<64x8xf32>, vector<8x128xf32>, vector<64x128xf32> -> vector<64x128xf32>
    %c0_19 = arith.constant 0 : index
    %c0_20 = arith.constant 0 : index
    %21 = vector.load %arg14[%c0_19, %c0_20] : memref<1x128xf32, #tpu.memory_space<vmem>>, vector<1x128xf32>
    %22 = vector.broadcast %21 : vector<1x128xf32> to vector<64x128xf32>
    %23 = arith.addf %20, %22 : vector<64x128xf32>
    %cst_21 = arith.constant 0.000000e+00 : f32
    %24 = vector.broadcast %cst_21 : f32 to vector<64x128xf32>
    %25 = arith.maximumf %23, %24 : vector<64x128xf32>
    %c0_22 = arith.constant 0 : index
    %c0_23 = arith.constant 0 : index
    %26 = vector.load %arg13[%c0_22, %c0_23] : memref<128x128xf32, #tpu.memory_space<vmem>>, vector<128x128xf32>
    %cst_24 = arith.constant dense<0.000000e+00> : vector<64x128xf32>
    %27 = tpu.matmul %25, %26, %cst_24 {dimension_numbers = #tpu.dot_dimension_numbers<[1], [0], [0], [1], [0, 0, 1, 1], [], []>} : vector<64x128xf32>, vector<128x128xf32>, vector<64x128xf32> -> vector<64x128xf32>
    %c0_25 = arith.constant 0 : index
    %c0_26 = arith.constant 0 : index
    %28 = vector.load %arg8[%c0_25, %c0_26] : memref<64x1xf32, #tpu.memory_space<vmem>>, vector<64x1xf32>
    %c0_27 = arith.constant 0 : index
    %c0_28 = arith.constant 0 : index
    %29 = vector.load %arg9[%c0_27, %c0_28] : memref<1x128xf32, #tpu.memory_space<vmem>>, vector<1x128xf32>
    %30 = vector.broadcast %28 : vector<64x1xf32> to vector<64x128xf32>
    %31 = vector.broadcast %29 : vector<1x128xf32> to vector<64x128xf32>
    %32 = arith.addf %30, %31 : vector<64x128xf32>
    %cst_29 = arith.constant 0.000000e+00 : f32
    %33 = vector.broadcast %cst_29 : f32 to vector<64x128xf32>
    %34 = arith.cmpf ogt, %32, %33 : vector<64x128xf32>
    %cst_30 = arith.constant 2.000000e-01 : f32
    %35 = vector.broadcast %cst_30 : f32 to vector<64x128xf32>
    %36 = arith.mulf %35, %32 : vector<64x128xf32>
    %37 = arith.select %34, %32, %36 : vector<64x128xi1>, vector<64x128xf32>
    %38 = tpu.iota {dimensions = array<i32: 1>} : vector<64x128xi32>
    %c64_i32 = arith.constant 64 : i32
    %39 = arith.muli %arg0, %c64_i32 : i32
    %40 = tpu.iota {dimensions = array<i32: 0>} : vector<64x1xi32>
    %41 = vector.broadcast %39 : i32 to vector<64x1xi32>
    %42 = arith.addi %41, %40 : vector<64x1xi32>
    %43 = arith.extf %0 : vector<64x128xbf16> to vector<64x128xf32>
    %44 = vector.broadcast %42 : vector<64x1xi32> to vector<64x128xi32>
    %45 = arith.cmpi eq, %38, %44 : vector<64x128xi32>
    %46 = arith.extui %45 : vector<64x128xi1> to vector<64x128xi32>
    %47 = arith.sitofp %46 : vector<64x128xi32> to vector<64x128xf32>
    %48 = arith.addf %43, %47 : vector<64x128xf32>
    %cst_31 = arith.constant 0.000000e+00 : f32
    %49 = vector.broadcast %cst_31 : f32 to vector<64x128xf32>
    %50 = arith.cmpf ogt, %48, %49 : vector<64x128xf32>
    %cst_32 = arith.constant -1.000000e+30 : f32
    %51 = vector.broadcast %cst_32 : f32 to vector<64x128xf32>
    %52 = arith.select %50, %37, %51 : vector<64x128xi1>, vector<64x128xf32>
    %cst_33 = arith.constant dense<0xFF800000> : vector<64xf32>
    %53 = vector.multi_reduction <maximumf>, %52, %cst_33 [1] : vector<64x128xf32> to vector<64xf32>
    %54 = vector.shape_cast %53 : vector<64xf32> to vector<64x1xf32>
    %55 = vector.broadcast %54 : vector<64x1xf32> to vector<64x128xf32>
    %56 = arith.subf %52, %55 : vector<64x128xf32>
    %57 = math.exp %56 : vector<64x128xf32>
    %58 = arith.mulf %57, %48 : vector<64x128xf32>
    %cst_34 = arith.constant dense<0.000000e+00> : vector<64xf32>
    %59 = vector.multi_reduction <add>, %58, %cst_34 [1] : vector<64x128xf32> to vector<64xf32>
    %60 = vector.shape_cast %59 : vector<64xf32> to vector<64x1xf32>
    %61 = tpu.reciprocal %60 {approx = true} : vector<64x1xf32> -> vector<64x1xf32>
    %62 = vector.broadcast %61 : vector<64x1xf32> to vector<64x128xf32>
    %63 = arith.mulf %58, %62 : vector<64x128xf32>
    %64 = arith.truncf %63 : vector<64x128xf32> to vector<64x128xbf16>
    %c0_35 = arith.constant 0 : index
    %c0_36 = arith.constant 0 : index
    %65 = vector.load %arg10[%c0_35, %c0_36] : memref<128x128xbf16, #tpu.memory_space<vmem>>, vector<128x128xbf16>
    %cst_37 = arith.constant dense<0.000000e+00> : vector<64x128xf32>
    %66 = tpu.matmul %64, %65, %cst_37 {dimension_numbers = #tpu.dot_dimension_numbers<[1], [0], [0], [1], [0, 0, 1, 1], [], []>} : vector<64x128xbf16>, vector<128x128xbf16>, vector<64x128xf32> -> vector<64x128xf32>
    %67 = arith.addf %10, %16 : vector<64x128xf32>
    %68 = arith.addf %67, %27 : vector<64x128xf32>
    %69 = arith.addf %68, %66 : vector<64x128xf32>
    %c0_38 = arith.constant 0 : index
    %c0_39 = arith.constant 0 : index
    %70 = vector.load %arg15[%c0_38, %c0_39] : memref<1x128xf32, #tpu.memory_space<vmem>>, vector<1x128xf32>
    %71 = vector.broadcast %70 : vector<1x128xf32> to vector<64x128xf32>
    %72 = arith.addf %69, %71 : vector<64x128xf32>
    %cst_40 = arith.constant 0.000000e+00 : f32
    %73 = vector.broadcast %cst_40 : f32 to vector<64x128xf32>
    %74 = arith.maximumf %72, %73 : vector<64x128xf32>
    %c0_41 = arith.constant 0 : index
    %c0_42 = arith.constant 0 : index
    %75 = vector.load %arg16[%c0_41, %c0_42] : memref<64x128xf32, #tpu.memory_space<vmem>>, vector<64x128xf32>
    tpu.vector_store %arg16[%c0_41, %c0_42], %74 {strides = array<i32>} : memref<64x128xf32, #tpu.memory_space<vmem>>, vector<64x128xf32>,
    return
  }
  func.func @transform_0(%arg0: i32) -> (i32, i32) {
    %c0_i32 = arith.constant 0 : i32
    %c0_i32_0 = arith.constant 0 : i32
    return %arg0, %c0_i32 : i32, i32
  }
  func.func @transform_1(%arg0: i32) -> (i32, i32) {
    %c0_i32 = arith.constant 0 : i32
    %c0_i32_0 = arith.constant 0 : i32
    %c0_i32_1 = arith.constant 0 : i32
    return %c0_i32, %c0_i32_0 : i32, i32
  }
  func.func @transform_2(%arg0: i32) -> (i32, i32) {
    %c0_i32 = arith.constant 0 : i32
    %c0_i32_0 = arith.constant 0 : i32
    return %arg0, %c0_i32 : i32, i32
  }
  func.func @transform_3(%arg0: i32) -> (i32, i32) {
    %c0_i32 = arith.constant 0 : i32
    %c0_i32_0 = arith.constant 0 : i32
    return %arg0, %c0_i32 : i32, i32
  }
  func.func @transform_4(%arg0: i32) -> (i32, i32) {
    %c0_i32 = arith.constant 0 : i32
    %c0_i32_0 = arith.constant 0 : i32
    return %arg0, %c0_i32 : i32, i32
  }
  func.func @transform_5(%arg0: i32) -> (i32, i32) {
    %c0_i32 = arith.constant 0 : i32
    %c0_i32_0 = arith.constant 0 : i32
    return %arg0, %c0_i32 : i32, i32
  }
  func.func @transform_6(%arg0: i32) -> (i32, i32) {
    %c0_i32 = arith.constant 0 : i32
    %c0_i32_0 = arith.constant 0 : i32
    return %arg0, %c0_i32 : i32, i32
  }
  func.func @transform_7(%arg0: i32) -> (i32, i32) {
    %c0_i32 = arith.constant 0 : i32
    %c0_i32_0 = arith.constant 0 : i32
    return %arg0, %c0_i32 : i32, i32
  }
  func.func @transform_8(%arg0: i32) -> (i32, i32) {
    %c0_i32 = arith.constant 0 : i32
    %c0_i32_0 = arith.constant 0 : i32
    %c0_i32_1 = arith.constant 0 : i32
    return %c0_i32, %c0_i32_0 : i32, i32
  }
  func.func @transform_9(%arg0: i32) -> (i32, i32) {
    %c0_i32 = arith.constant 0 : i32
    %c0_i32_0 = arith.constant 0 : i32
    %c0_i32_1 = arith.constant 0 : i32
    return %c0_i32, %c0_i32_0 : i32, i32
  }
  func.func @transform_10(%arg0: i32) -> (i32, i32) {
    %c0_i32 = arith.constant 0 : i32
    %c0_i32_0 = arith.constant 0 : i32
    %c0_i32_1 = arith.constant 0 : i32
    return %c0_i32, %c0_i32_0 : i32, i32
  }
  func.func @transform_11(%arg0: i32) -> (i32, i32) {
    %c0_i32 = arith.constant 0 : i32
    %c0_i32_0 = arith.constant 0 : i32
    %c0_i32_1 = arith.constant 0 : i32
    return %c0_i32, %c0_i32_0 : i32, i32
  }
  func.func @transform_12(%arg0: i32) -> (i32, i32) {
    %c0_i32 = arith.constant 0 : i32
    %c0_i32_0 = arith.constant 0 : i32
    %c0_i32_1 = arith.constant 0 : i32
    return %c0_i32, %c0_i32_0 : i32, i32
  }
  func.func @transform_13(%arg0: i32) -> (i32, i32) {
    %c0_i32 = arith.constant 0 : i32
    %c0_i32_0 = arith.constant 0 : i32
    %c0_i32_1 = arith.constant 0 : i32
    return %c0_i32, %c0_i32_0 : i32, i32
  }
  func.func @transform_14(%arg0: i32) -> (i32, i32) {
    %c0_i32 = arith.constant 0 : i32
    %c0_i32_0 = arith.constant 0 : i32
    %c0_i32_1 = arith.constant 0 : i32
    return %c0_i32, %c0_i32_0 : i32, i32
  }
  func.func @transform_15(%arg0: i32) -> (i32, i32) {
    %c0_i32 = arith.constant 0 : i32
    %c0_i32_0 = arith.constant 0 : i32
    return %arg0, %c0_i32 : i32, i32
  }
}

</mosaic_0001>

<bundles_post_ra>
// kernel: tpu_custom_call.1
= control target key start
LH: loop header
LB: loop body
LE: loop exit
PB: predicated region body
PF: predicated region fallthrough
CT: control target
= control target key end

     0   :  { %s3036_s0 = inlined_call_operand.vmem [shape: bf16[128,128], index: 0, kind: input, shape index: {}]   ;;  %s3037_s1 = inlined_call_operand.vmem [shape: bf16[128,136], index: 1, kind: input, shape index: {}]   ;;  %s3038_s2 = inlined_call_operand.vmem [shape: f32[128,8], index: 2, kind: input, shape index: {}]   ;;  %s3039_s3 = inlined_call_operand.vmem [shape: f32[128,128], index: 3, kind: input, shape index: {}]   ;;  %s3040_s4 = inlined_call_operand.vmem [shape: f32[128,128], index: 4, kind: input, shape index: {}]   ;;  %s3041_s5 = inlined_call_operand.vmem [shape: f32[128,1], index: 5, kind: input, shape index: {}]   ;;  %s3042_s6 = inlined_call_operand.vmem [shape: f32[128,1], index: 6, kind: input, shape index: {}]   ;;  %s3043_s7 = inlined_call_operand.vmem [shape: f32[128,1], index: 7, kind: input, shape index: {}]   ;;  %s3044_s8 = inlined_call_operand.vmem [shape: f32[1,128], index: 8, kind: input, shape index: {}]   ;;  %s3045_s9 = inlined_call_operand.vmem [shape: bf16[128,128], index: 9, kind: input, shape index: {}]   ;;  %s3046_s10 = inlined_call_operand.vmem [shape: f32[8,128], index: 10, kind: input, shape index: {}]   ;;  %s3047_s11 = inlined_call_operand.vmem [shape: f32[8,128], index: 11, kind: input, shape index: {}]   ;;  %s3048_s12 = inlined_call_operand.vmem [shape: f32[128,128], index: 12, kind: input, shape index: {}]   ;;  %s3049_s13 = inlined_call_operand.vmem [shape: f32[1,128], index: 13, kind: input, shape index: {}]   ;;  %s3050_s14 = inlined_call_operand.vmem [shape: f32[1,128], index: 14, kind: input, shape index: {}]   ;;  %s3051_s15 = inlined_call_operand.hbm [shape: f32[128,128], index: 15, kind: output, shape index: {}]  }
   0x1   :  { %3057 = sst [smem:[#allocation10_spill]] %s3042_s6 }
   0x2   :  { %20 = vsyncpa [#allocation3], 0 }
   0x3   :  { %22 = vsyncpa [#allocation3 + $0x1], 0  ;;  %s2454_s18 = smov 0   ;;  %s2456_s19 = smov 0  }
   0x4   :  { %s2458_s20 = smov 0   ;;  %s2460_s21 = smov 0  }
   0x5 LB: > { %3058 = sst [smem:[#allocation5_spill]] %s2355_s18  ;;  %s2475_s22 = sadd.s32 4294967295, %s2367_s21   ;;  %s2367_s21 = sphi %s2460_s21, %s3068_s21   ;;  %s2363_s20 = sphi %s2458_s20, %s3070_s20   ;;  %s2359_s19 = sphi %s2456_s19, %s3072_s19   ;;  %s2355_s18 = sphi %s2454_s18, %s3071_s18  }
   0x6   : > { %3059 = sst [smem:[#allocation6_spill]] %s2363_s20  ;;  %s1959_s23 = sadd.s32 4294967294, %s2367_s21  }
   0x7   : > { %s2479_s24 = sadd.s32 1, %s2367_s21   ;;  %s385_s25 = sadd.s32 1, %s2363_s20 }
   0x8   : > { %3060 = sst [smem:[#allocation7_spill]] %s2479_s24  ;;  %s382_s26 = ssub.s32 %s2367_s21, %s2479_s24 }
   0x9   : > { %p395_p0 = scmp.ne.s32.totalorder %s2363_s20, %s2359_s19  ;;  %p383_p1 = scmp.eq.s32.totalorder %s382_s26, 0 }
   0xa   : > { %p396_p2 = scmp.eq.s32.totalorder %s2475_s22, 1  ;;  %p401_p3 = scmp.ne.s32.totalorder %s2359_s19, %s2355_s18 }
   0xb   : > { %p402_p4 = scmp.eq.s32.totalorder %s1959_s23, 1  ;;  %p1962_p7 = scmp.ge.s32.totalorder %s2367_s21, 1 }
   0xc   : > { %s2490_s27 = scalar_select %p383_p1, %s2363_s20, %s385_s25  }
   0xd   : > { %p2492_p5 = por %p396_p2, %p395_p0  ;;  %p2496_p6 = por %p402_p4, %p401_p3 }
   0xe   : > { %3061 = sst [smem:[#allocation8_spill]] %s2490_s27  ;;  %p507_p8 = scmp.lt.s32.totalorder %s2367_s21, 3 }
   0xf   : > { %s3063_s29 = scalar_select %p2496_p6, 1, 0 }
  0x10   : > { %p508_p9 = pnand %p1962_p7, %p507_p8 }
  0x11   : > { %3064 = sst [smem:[#allocation9_spill]] %s3063_s29  ;;  %s1964_s17 = sshll.u32 (!%p508_p9), %s2475_s22, 3 }
  0x12   : > { %511 = sbr.rel (%p508_p9) target bundleno = 724 (0x2d4), region = 80  ;;  %p586_p10 = scmp.lt.s32.totalorder (!%p508_p9), %s1964_s17, 15 }
  0x13   : > { %s3065_s6 = sld [smem:[#allocation10_spill]] (!%p508_p9)  ;;  %s2016_s30 = sshll.u32 (!%p508_p9), %s2475_s22, 6 }
  0x14   : > { %s2039_s26 = sshll.u32 (!%p508_p9), %s2475_s22, 10 }
  0x17   : > { %v2235_v0 = vld [vmem:[%s3037_s1 + $0x74] ss:$8 sps:$4 sm:$0xff]   ;;  %v2237_v1 = vld [vmem:[%s3037_s1 + $0x70] ss:$8 sps:$4 sm:$0xff]   ;;  %v2369_v2 = vmov 0   ;;  %s3074_s17 = smov (!%p586_p10, %s1964_s17), 15  ;;  %v1466_v38 = vlaneseq  ;;  %v1478_v42 = vstv %s2016_s30 }
  0x18   : > { %2234 = vset.pattern.permute.xlu1 %v2369_v2  ;;  %2233 = vset.pattern.permute.xlu0 %v2369_v2  ;;  %v2238_v3 = vld [vmem:[%s3037_s1 + $0x64] ss:$8 sps:$4 sm:$0xff]   ;;  %v2240_v4 = vld [vmem:[%s3037_s1 + $0x60] ss:$8 sps:$4 sm:$0xff]   ;;  %s2521_s23 = sshll.u32 %s3074_s17, 3  ;;  %s1965_s29 = sshll.u32 %s3074_s17, 2 }
  0x19   : > { %757 = vmatprep.subr.bf16.mxu0 %v2235_v0  ;;  %789 = vmatprep.mubr.bf16.mxu0 %v2369_v2  ;;  %v2241_v5 = vld [vmem:[%s3037_s1 + $0x54] ss:$8 sps:$4 sm:$0xff]   ;;  %s619_s24 = scalar_lea.vmem %s3065_s6, %s2521_s23  ;;  %v2243_v8 = vld [vmem:[%s3037_s1 + $0x50] ss:$8 sps:$4 sm:$0xff]   ;;  %v2244_v9 = vld [vmem:[%s3037_s1 + $0x44] ss:$8 sps:$4 sm:$0xff]   ;;  %s2552_s27 = scalar_lea.vmem %s3043_s7, %s2521_s23 }
  0x1a   : > { %758 = vmatpush1.bf16.msra.mxu0 %v2237_v1  ;;  %v840_v6 = vld [vmem:[%s619_s24 + $0x10] sm:$0xff]  ;;  %v838_v7 = vld [vmem:[%s619_s24] sm:$0xff]  ;;  %v841_v10 = vld [vmem:[%s619_s24 + $0x18] sm:$0xff]  ;;  %s589_s25 = scalar_lea.vmem %s3036_s0, %s1965_s29  ;;  %v1470_v39 = vshrl.u32 %v1466_v38, 7  ;;  %v2610_v45 = vand.u32 127, %v1466_v38  ;;  %v2370_v58 = vmov 0.0   ;;  %s613_s18 = scalar_lea.vmem %s3041_s5, %s2521_s23 }
  0x1b   : > { %759 = vmatprep.subr.bf16.mxu0 %v2238_v3  ;;  %922 = vperm.xlu1 %2234, %v840_v6   ;;  %v839_v11 = vld [vmem:[%s619_s24 + $0x8] sm:$0xff]  ;;  %v2247_v14 = vld [vmem:[%s3037_s1 + $0x34] ss:$8 sps:$4 sm:$0xff]   ;;  %v842_v15 = vld [vmem:[%s619_s24 + $0x20] sm:$0xff]  ;;  %s2923_s30 = scalar_lea.vmem %s3040_s4, %s2521_s23 }
  0x1c   : > { %912 = vperm.xlu0 %2233, %v838_v7   ;;  %v2246_v12 = vld [vmem:[%s3037_s1 + $0x40] ss:$8 sps:$4 sm:$0xff]   ;;  %v2249_v16 = vld [vmem:[%s3037_s1 + $0x30] ss:$8 sps:$4 sm:$0xff]   ;;  %v2250_v19 = vld [vmem:[%s3037_s1 + $0x24] ss:$8 sps:$4 sm:$0xff]   ;;  %v1479_v48 = vadd.s32 %v1478_v42, %v1470_v39 }
  0x1d   : > { %v843_v13 = vld [vmem:[%s619_s24 + $0x28] sm:$0xff]  ;;  %v845_v17 = vld [vmem:[%s619_s24 + $0x38] sm:$0xff]  ;;  %v844_v18 = vld [vmem:[%s619_s24 + $0x30] sm:$0xff]  ;;  %v1471_v40 = vadd.s32 8, %v1470_v39  ;;  %v1472_v47 = vadd.s32 16, %v1470_v39  ;;  %v1473_v51 = vadd.s32 24, %v1470_v39  ;;  %s595_s24 = scalar_lea.vmem %s3038_s2, %s2521_s23 }
  0x1e   : > { %760 = vmatpush1.bf16.msra.mxu0 %v2240_v4  ;;  %v2252_v20 = vld [vmem:[%s3037_s1 + $0x20] ss:$8 sps:$4 sm:$0xff]   ;;  %v2253_v23 = vld [vmem:[%s3037_s1 + $0x14] ss:$8 sps:$4 sm:$0xff]   ;;  %v2255_v24 = vld [vmem:[%s3037_s1 + $0x10] ss:$8 sps:$4 sm:$0xff]   ;;  %vm1495_vm1 = vcmp.eq.s32.totalorder %v2610_v45, %v1479_v48 }
  0x1f   : > { %761 = vmatprep.subr.bf16.mxu0 %v2241_v5  ;;  %927 = vperm.xlu1 %2234, %v841_v10   ;;  %v1380_v21 = vld [vmem:[%s2552_s27 + $0x8] sm:$0xff]  ;;  %v1379_v22 = vld [vmem:[%s2552_s27] sm:$0xff]  ;;  %v1382_v25 = vld [vmem:[%s2552_s27 + $0x18] sm:$0xff]  ;;  %v1480_v46 = vadd.s32 %v1478_v42, %v1471_v40  ;;  %v1481_v52 = vadd.s32 %v1478_v42, %v1472_v47  ;;  %v1474_v53 = vadd.s32 32, %v1470_v39  ;;  %v1482_v57 = vadd.s32 %v1478_v42, %v1473_v51 }
  0x20   : > { %917 = vperm.xlu0 %2233, %v839_v11   ;;  %v1381_v26 = vld [vmem:[%s2552_s27 + $0x10] sm:$0xff]  ;;  %v2256_v27 = vld [vmem:[%s3037_s1 + $0x4] ss:$8 sps:$4 sm:$0xff]   ;;  %v2258_v28 = vld [vmem:[%s3037_s1] ss:$8 sps:$4 sm:$0xff]   ;;  %v1475_v61 = vadd.s32 40, %v1470_v39 }
  0x21   : > { %v2577_v29 = vld [vmem:[%s589_s25] sm:$0xff]   ;;  %v1384_v30 = vld [vmem:[%s2552_s27 + $0x28] sm:$0xff]  ;;  %v1386_v32 = vld [vmem:[%s2552_s27 + $0x38] sm:$0xff]  ;;  %vm1496_vm0 = vcmp.eq.s32.totalorder %v2610_v45, %v1480_v46  ;;  %v2017_v62 = vsel %vm1495_vm1, 1.0, %v2370_v58  ;;  %vm1497_vm2 = vcmp.eq.s32.totalorder %v2610_v45, %v1481_v52  ;;  %v1483_v63 = vadd.s32 %v1478_v42, %v1474_v53 }
  0x22   : > { %762 = vmatpush1.bf16.msra.mxu0 %v2243_v8  ;;  %v1383_v31 = vld [vmem:[%s2552_s27 + $0x20] sm:$0xff]  ;;  %v1385_v33 = vld [vmem:[%s2552_s27 + $0x30] sm:$0xff]  ;;  %v2585_v34 = vld [vmem:[%s589_s25 + $0x8] sm:$0xff]   ;;  %v1488_v56 = vunpack.c.h.bf16 %v2577_v29  ;;  %v2018_v59 = vsel %vm1496_vm0, 1.0, %v2370_v58  ;;  %v1487_v60 = vunpack.c.l.bf16 %v2577_v29  ;;  %v1476_v0 = vadd.s32 48, %v1470_v39  ;;  %s2988_s27 = scalar_lea.hbm %s3051_s15, %s2039_s26 }
  0x23   : > { %763 = vmatprep.subr.bf16.mxu0 %v2244_v9  ;;  %937 = vperm.xlu1 %2234, %v843_v13   ;;  %v2589_v35 = vld [vmem:[%s589_s25 + $0x10] sm:$0xff]   ;;  %v2593_v36 = vld [vmem:[%s589_s25 + $0x18] sm:$0xff]   ;;  %v958_v37 = vld [vmem:[%s3046_s10] sm:$0xff]  ;;  %v1489_v4 = vunpack.c.l.bf16 %v2585_v34  ;;  %vm1498_vm3 = vcmp.eq.s32.totalorder %v2610_v45, %v1482_v57  ;;  %v2019_v6 = vsel %vm1497_vm2, 1.0, %v2370_v58  ;;  %v1484_v7 = vadd.s32 %v1478_v42, %v1475_v61 }
  0x24   : > { %932 = vperm.xlu0 %2233, %v842_v15   ;;  %2094 = vmatprep.subr.mxu1 %v958_v37  ;;  %v2603_v41 = vld [vmem:[%s3047_s11] sm:$0xff]  ;;  %v2631_v3 = vadd.f32 %v2018_v59, %v1488_v56  ;;  %v2635_v5 = vadd.f32 %v2017_v62, %v1487_v60  ;;  %vm1499_vm4 = vcmp.eq.s32.totalorder %v2610_v45, %v1483_v63  ;;  %v1490_v9 = vunpack.c.h.bf16 %v2585_v34 }
  0x25   : > { %2095 = vmatpush3.msra.mxu1 %v958_v37  ;;  %v2641_v8 = vld [vmem:[%s3044_s8] ss:$0 sm:$0xff]  ;;  %v1485_v10 = vadd.s32 %v1478_v42, %v1476_v0  ;;  %v1477_v11 = vadd.s32 56, %v1470_v39  ;;  %v2647_v15 = vadd.f32 %v2019_v6, %v1489_v4  ;;  %vm1500_vm6 = vcmp.eq.s32.totalorder %v2610_v45, %v1484_v7 }
  0x26   : > { %764 = vmatpush1.bf16.msra.mxu0 %v2246_v12  ;;  %2108 = vmatprep.subr.mxu1 %v2603_v41  ;;  %v2020_v12 = vsel %vm1498_vm3, 1.0, %v2370_v58  ;;  %vm1528_vm5 = vcmp.gt.f32.partialorder %v2631_v3, 0.0  ;;  %vm1527_vm7 = vcmp.gt.f32.partialorder %v2635_v5, 0.0  ;;  %v1493_v37 = vunpack.c.l.bf16 %v2593_v36 }
  0x27   : > { %765 = vmatprep.subr.bf16.mxu0 %v2247_v14  ;;  %947 = vperm.xlu1 %2234, %v845_v17   ;;  %vm1501_vm8 = vcmp.eq.s32.totalorder %v2610_v45, %v1485_v10  ;;  %vm1529_vm11 = vcmp.gt.f32.partialorder %v2647_v15, 0.0 }
  0x28   : > { %942 = vperm.xlu0 %2233, %v844_v18  }
  0x2a   : > { %766 = vmatpush1.bf16.msra.mxu0 %v2249_v16  ;;  %v1491_v16 = vunpack.c.l.bf16 %v2589_v35 }
  0x2b   : > { %767 = vmatprep.subr.bf16.mxu0 %v2250_v19  ;;  %1395 = vperm.xlu1 %2234, %v1380_v21   ;;  %v2021_v19 = vsel %vm1499_vm4, 1.0, %v2370_v58  ;;  %v1486_v21 = vadd.s32 %v1478_v42, %v1477_v11 }
  0x2c   : > { %1390 = vperm.xlu0 %2233, %v1379_v22  }
  0x2d   : > { %vm1502_vm13 = vcmp.eq.s32.totalorder %v2610_v45, %v1486_v21  ;;  %v1494_v45 = vunpack.c.h.bf16 %v2593_v36 }
  0x2e   : > { %768 = vmatpush1.bf16.msra.mxu0 %v2252_v20  ;;  %v2655_v20 = vadd.f32 %v2020_v12, %v1490_v9  ;;  %v2024_v56 = vsel %vm1502_vm13, 1.0, %v2370_v58 }
  0x2f   : > { %769 = vmatprep.subr.bf16.mxu0 %v2253_v23  ;;  %1405 = vperm.xlu1 %2234, %v1382_v25   ;;  %v2707_v6 = vadd.f32 %v2024_v56, %v1494_v45  ;;  %v1101_v45 = vld [vmem:[%s595_s24 + $0x20] sm:$0xff] }
  0x30   : > { %1400 = vperm.xlu0 %2233, %v1381_v26   ;;  %v2659_v26 = vadd.f32 %v2021_v19, %v1491_v16  ;;  %vm1530_vm15 = vcmp.gt.f32.partialorder %v2655_v20, 0.0 }
  0x32   : > { %770 = vmatpush1.bf16.msra.mxu0 %v2255_v24  ;;  %vm1531_vm0 = vcmp.gt.f32.partialorder %v2659_v26, 0.0 }
  0x33   : > { %771 = vmatprep.subr.bf16.mxu0 %v2256_v27  ;;  %1415 = vperm.xlu1 %2234, %v1384_v30   ;;  %v1492_v27 = vunpack.c.h.bf16 %v2589_v35 }
  0x34   : > { %1410 = vperm.xlu0 %2233, %v1383_v31  }
  0x36   : > { %772 = vmatpush1.bf16.msra.mxu0 %v2258_v28  ;;  %v2022_v28 = vsel %vm1500_vm6, 1.0, %v2370_v58 }
  0x37   : > { %1425 = vperm.xlu1 %2234, %v1386_v32   ;;  %v2681_v46 = vadd.f32 %v2022_v28, %v1492_v27 }
  0x38   : > { %1420 = vperm.xlu0 %2233, %v1385_v33  }
  0x39   : > { %790 = vmatmul.mubr.bf16.vlgmr.msra.gmra.mxu0 %v2577_v29  ;;  %vm1532_vm3 = vcmp.gt.f32.partialorder %v2681_v46, 0.0 }
  0x3a   : > { %799 = vmatprep.mubr.bf16.mxu0 %v2369_v2 }
  0x41   : > { %800 = vmatmul.mubr.bf16.gmra.mxu0 %v2585_v34 }
  0x42   : > { %809 = vmatprep.mubr.bf16.mxu0 %v2369_v2 }
  0x49   : > { %810 = vmatmul.mubr.bf16.gmra.mxu0 %v2589_v35  ;;  %v2023_v35 = vsel %vm1501_vm8, 1.0, %v2370_v58  ;;  %vm967_vm8 = vcmask 64512  }
  0x4a   : > { %819 = vmatprep.mubr.bf16.mxu0 %v2369_v2  ;;  %v2690_v53 = vadd.f32 %v2023_v35, %v1493_v37 }
  0x4c   : > { %vm1533_vm4 = vcmp.gt.f32.partialorder %v2690_v53, 0.0 }
  0x51   : > { %820 = vmatmul.mubr.bf16.gmra.mxu0 %v2593_v36 }
  0x96   : > { %v2606_v43 = vpop.permute.xlu1 %922 }
  0x97   : > { %v2608_v44 = vpop.permute.xlu0 %912 }
  0x9a   : > { %v2612_v49 = vpop.permute.xlu1 %927 }
  0x9b   : > { %v2614_v50 = vpop.permute.xlu0 %917 }
  0x9e   : > { %v2618_v54 = vpop.permute.xlu1 %937 }
  0x9f   : > { %v2620_v55 = vpop.permute.xlu0 %932 }
  0xa2   : > { %v2627_v1 = vpop.permute.xlu1 %947 }
  0xa3   : > { %v2629_v2 = vpop.permute.xlu0 %942 }
  0xa6   : > { %v1396_v13 = vpop.permute.xlu1 %1395 }
  0xa7   : > { %v1391_v14 = vpop.permute.xlu0 %1390  ;;  %v1435_v17 = vadd.f32 %v2641_v8, %v1396_v13 }
  0xa8   : > { %v1434_v18 = vadd.f32 %v2641_v8, %v1391_v14 }
  0xa9   : > { %v1451_v22 = vmul.f32 0.2, %v1435_v17  ;;  %vm1443_vm9 = vcmp.gt.f32.partialorder %v1435_v17, 0.0 }
  0xaa   : > { %v1450_v23 = vmul.f32 0.2, %v1434_v18  ;;  %vm1442_vm10 = vcmp.gt.f32.partialorder %v1434_v18, 0.0  ;;  %v1406_v24 = vpop.permute.xlu1 %1405 }
  0xab   : > { %v1401_v25 = vpop.permute.xlu0 %1400  ;;  %v1437_v29 = vadd.f32 %v2641_v8, %v1406_v24  ;;  %v1459_v31 = vsel %vm1443_vm9, %v1435_v17, %v1451_v22 }
  0xac   : > { %v1436_v30 = vadd.f32 %v2641_v8, %v1401_v25  ;;  %v1458_v32 = vsel %vm1442_vm10, %v1434_v18, %v1450_v23  ;;  %v2667_v33 = vsel %vm1528_vm5, %v1459_v31, -1e+30 }
  0xad   : > { %v2671_v34 = vsel %vm1527_vm7, %v1458_v32, -1e+30  ;;  %v1453_v38 = vmul.f32 0.2, %v1437_v29  ;;  %1545 = vmax.xlane.f32.xlu1 %v2667_v33  ;;  %vm1445_vm14 = vcmp.gt.f32.partialorder %v1437_v29, 0.0  ;;  %vm1534_vm7 = vcmp.gt.f32.partialorder %v2707_v6, 0.0 }
  0xae   : > { %v1452_v39 = vmul.f32 0.2, %v1436_v30  ;;  %1543 = vmax.xlane.f32.xlu0 %v2671_v34  ;;  %vm1444_vm12 = vcmp.gt.f32.partialorder %v1436_v30, 0.0  ;;  %v1416_v40 = vpop.permute.xlu1 %1415 }
  0xaf   : > { %v1411_v42 = vpop.permute.xlu0 %1410  ;;  %v1439_v47 = vadd.f32 %v2641_v8, %v1416_v40  ;;  %v1461_v60 = vsel %vm1445_vm14, %v1437_v29, %v1453_v38  ;;  %v1098_v40 = vld [vmem:[%s595_s24 + $0x8] sm:$0xff] }
  0xb0   : > { %v1438_v48 = vadd.f32 %v2641_v8, %v1411_v42  ;;  %v1460_v51 = vsel %vm1444_vm12, %v1436_v30, %v1452_v39  ;;  %v2704_v58 = vsel %vm1530_vm15, %v1461_v60, -1e+30  ;;  %v1099_v42 = vld [vmem:[%s595_s24 + $0x10] sm:$0xff] }
  0xb1   : > { %v2688_v52 = vsel %vm1529_vm11, %v1460_v51, -1e+30  ;;  %v1455_v57 = vmul.f32 0.2, %v1439_v47  ;;  %vm1447_vm2 = vcmp.gt.f32.partialorder %v1439_v47, 0.0  ;;  %v1100_v51 = vld [vmem:[%s595_s24 + $0x18] sm:$0xff] }
  0xb2   : > { %v1454_v59 = vmul.f32 0.2, %v1438_v48  ;;  %1547 = vmax.xlane.f32.xlu0 %v2688_v52  ;;  %vm1446_vm1 = vcmp.gt.f32.partialorder %v1438_v48, 0.0  ;;  %v1426_v61 = vpop.permute.xlu1 %1425 }
  0xb3   : > { %v1421_v62 = vpop.permute.xlu0 %1420  ;;  %v1441_v63 = vadd.f32 %v2641_v8, %v1426_v61  ;;  %v1104_v61 = vld [vmem:[%s595_s24 + $0x38] sm:$0xff] }
  0xb4   : > { %v1440_v0 = vadd.f32 %v2641_v8, %v1421_v62  ;;  %v1462_v4 = vsel %vm1446_vm1, %v1438_v48, %v1454_v59  ;;  %v1463_v8 = vsel %vm1447_vm2, %v1439_v47, %v1455_v57  ;;  %v1102_v57 = vld [vmem:[%s595_s24 + $0x28] sm:$0xff]  ;;  %v1103_v59 = vld [vmem:[%s595_s24 + $0x30] sm:$0xff] }
  0xb5   : > { %v2700_v36 = vsel %vm1531_vm0, %v1462_v4, -1e+30  ;;  %v1457_v7 = vmul.f32 0.2, %v1441_v63  ;;  %vm1449_vm6 = vcmp.gt.f32.partialorder %v1441_v63, 0.0 }
  0xb6   : > { %v1456_v9 = vmul.f32 0.2, %v1440_v0  ;;  %1551 = vmax.xlane.f32.xlu1 %v2700_v36  ;;  %1549 = vmax.xlane.f32.xlu0 %v2704_v58  ;;  %vm1448_vm5 = vcmp.gt.f32.partialorder %v1440_v0, 0.0  ;;  %v2713_v12 = vsel %vm1532_vm3, %v1463_v8, -1e+30 }
  0xb7   : > { %v1465_v13 = vsel %vm1449_vm6, %v1441_v63, %v1457_v7 }
  0xb8   : > { %v1464_v10 = vsel %vm1448_vm5, %v1440_v0, %v1456_v9  ;;  %v2718_v14 = vsel %vm1534_vm7, %v1465_v13, -1e+30 }
  0xb9   : > { %v2711_v11 = vsel %vm1533_vm4, %v1464_v10, -1e+30 }
  0xba   : > { %1555 = vmax.xlane.f32.xlu1 %v2711_v11  ;;  %1553 = vmax.xlane.f32.xlu0 %v2713_v12 }
  0xbe   : > { %1557 = vmax.xlane.f32.xlu0 %v2718_v14 }
  0xf9   : > { %v2721_v16 = vpop.f32.mrf.mxu0 }
  0xfb   : > { %v793_v17 = vpop.f32.mrf.mxu0 }
  0xfc   : > { %v950_v18 = vmul.f32 %v2608_v44, %v793_v17 }
  0xfd   : > { %v2724_v19 = vpop.f32.mrf.mxu0 }
  0xfe   : > { %2096 = vmatprep.mubr.msk.f32.mxu1 %vm967_vm8, %v950_v18 }
  0xff   : > { %v797_v21 = vpop.f32.mrf.mxu0 }
 0x100   : > { %v951_v22 = vmul.f32 %v2614_v50, %v797_v21  ;;  %v1106_v47 = vadd.f32 %v1098_v40, %v797_v21  ;;  %v1268_v40 = vld [vmem:[%s3048_s12 + $0x50] sm:$0xff] }
 0x101   : > { %v2728_v23 = vpop.f32.mrf.mxu0 }
 0x102   : > { %2097 = vmatmul.mubr.msk.f32.vlgmr.msra.gmra.mxu1 %vm967_vm8, %v951_v22 }
 0x103   : > { %v803_v24 = vpop.f32.mrf.mxu0  ;;  %2109 = vmatpush3.msra.mxu1 %v2603_v41 }
 0x104   : > { %v952_v25 = vmul.f32 %v2606_v43, %v803_v24  ;;  %v1107_v48 = vadd.f32 %v1099_v42, %v803_v24 }
 0x105   : > { %v2733_v27 = vpop.f32.mrf.mxu0 }
 0x106   : > { %2099 = vmatprep.mubr.msk.f32.mxu1 %vm967_vm8, %v952_v25 }
 0x107   : > { %v807_v44 = vpop.f32.mrf.mxu0 }
 0x108   : > { %v953_v28 = vmul.f32 %v2612_v49, %v807_v44 }
 0x109   : > { %v2737_v29 = vpop.f32.mrf.mxu0 }
 0x10a   : > { %2100 = vmatmul.mubr.msk.f32.gmra.mxu1 %vm967_vm8, %v953_v28 }
 0x10b   : > { %v813_v50 = vpop.f32.mrf.mxu0 }
 0x10c   : > { %v954_v30 = vmul.f32 %v2620_v55, %v813_v50  ;;  %v1097_v55 = vld [vmem:[%s595_s24] sm:$0xff]  ;;  %v1109_v56 = vadd.f32 %v1101_v45, %v813_v50  ;;  %v2264_v45 = vld [vmem:[%s3045_s9 + $0x30] sm:$0xff]  }
 0x10d   : > { %v2741_v31 = vpop.f32.mrf.mxu0 }
 0x10e   : > { %2102 = vmatprep.mubr.msk.f32.mxu1 %vm967_vm8, %v954_v30 }
 0x10f   : > { %v817_v41 = vpop.f32.mrf.mxu0 }
 0x110   : > { %v955_v43 = vmul.f32 %v2618_v54, %v817_v41  ;;  %v1105_v54 = vadd.f32 %v1097_v55, %v793_v17 }
 0x111   : > { %v2745_v32 = vpop.f32.mrf.mxu0 }
 0x112   : > { %2103 = vmatmul.mubr.msk.f32.gmra.mxu1 %vm967_vm8, %v955_v43  ;;  %v1271_v43 = vld [vmem:[%s3048_s12 + $0x68] sm:$0xff] }
 0x113   : > { %v823_v49 = vpop.f32.mrf.mxu0 }
 0x114   : > { %v956_v37 = vmul.f32 %v2629_v2, %v823_v49  ;;  %v1108_v2 = vadd.f32 %v1100_v51, %v807_v44  ;;  %v1111_v60 = vadd.f32 %v1103_v59, %v823_v49 }
 0x115   : > { %v2753_v35 = vpop.f32.mrf.mxu0 }
 0x116   : > { %2105 = vmatprep.mubr.msk.f32.mxu1 %vm967_vm8, %v956_v37 }
 0x117   : > { %v827_v38 = vpop.f32.mrf.mxu0 }
 0x118   : > { %v957_v39 = vmul.f32 %v2627_v1, %v827_v38  ;;  %v1110_v1 = vadd.f32 %v1102_v57, %v817_v41  ;;  %v1112_v62 = vadd.f32 %v1104_v61, %v827_v38  ;;  %v1263_v61 = vld [vmem:[%s3048_s12 + $0x28] sm:$0xff] }
 0x11a   : > { %2106 = vmatmul.mubr.msk.f32.gmra.mxu1 %vm967_vm8, %v957_v39  ;;  %v1269_v39 = vld [vmem:[%s3048_s12 + $0x58] sm:$0xff] }
 0x11b   : > { %2110 = vmatprep.mubr.msk.f32.mxu1 %vm967_vm8, %v1105_v54 }
 0x11e   : > { %2111 = vmatmul.mubr.msk.f32.vlgmr.msra.gmra.mxu1 %vm967_vm8, %v1106_v47 }
 0x11f   : > { %2113 = vmatprep.mubr.msk.f32.mxu1 %vm967_vm8, %v1107_v48  ;;  %v1266_v48 = vld [vmem:[%s3048_s12 + $0x40] sm:$0xff] }
 0x122   : > { %2114 = vmatmul.mubr.msk.f32.gmra.mxu1 %vm967_vm8, %v1108_v2  ;;  %v1265_v2 = vld [vmem:[%s3048_s12 + $0x38] sm:$0xff] }
 0x123   : > { %2116 = vmatprep.mubr.msk.f32.mxu1 %vm967_vm8, %v1109_v56 }
 0x126   : > { %2117 = vmatmul.mubr.msk.f32.gmra.mxu1 %vm967_vm8, %v1110_v1 }
 0x127   : > { %2119 = vmatprep.mubr.msk.f32.mxu1 %vm967_vm8, %v1111_v60  ;;  %v2265_v60 = vld [vmem:[%s3045_s9 + $0x28] sm:$0xff]  }
 0x12a   : > { %2120 = vmatmul.mubr.msk.f32.gmra.mxu1 %vm967_vm8, %v1112_v62 }
 0x136   : > { %v1546_v63 = vpop.xlane.xlu1 %1545 }
 0x137   : > { %v1544_v0 = vpop.xlane.xlu0 %1543  ;;  %v1560_v4 = vsub.f32 %v2667_v33, %v1546_v63  ;;  %v1273_v33 = vld [vmem:[%s3048_s12 + $0x78] sm:$0xff]  ;;  %v2266_v63 = vld [vmem:[%s3045_s9 + $0x20] sm:$0xff]  }
 0x138   : > { %v1559_v7 = vsub.f32 %v2671_v34, %v1544_v0  ;;  %v1272_v34 = vld [vmem:[%s3048_s12 + $0x70] sm:$0xff]  ;;  %2122 = vmatprep.subr.mxu1 %v1273_v33  ;;  %v1261_v0 = vld [vmem:[%s3048_s12 + $0x18] sm:$0xff] }
 0x139   : > { %v1569_v9 = vmul.f32 1.442695, %v1560_v4  ;;  %2123 = vmatpush3.msra.mxu1 %v1273_v33  ;;  %v2267_v4 = vld [vmem:[%s3045_s9 + $0x18] sm:$0xff]   ;;  %v836_v33 = vld [vmem:[%s613_s18 + $0x30] sm:$0xff] }
 0x13a   : > { %v1567_v8 = vmul.f32 1.442695, %v1559_v7  ;;  %2124 = vmatprep.subr.mxu1 %v1272_v34  ;;  %v1259_v7 = vld [vmem:[%s3048_s12 + $0x8] sm:$0xff] }
 0x13b   : > { %v1548_v10 = vpop.xlane.xlu0 %1547  ;;  %2275 = vpow2.f32 %v1569_v9  ;;  %2125 = vmatpush3.msra.mxu1 %v1272_v34  ;;  %v1258_v9 = vld [vmem:[%s3048_s12] sm:$0xff] }
 0x13c   : > { %v1561_v13 = vsub.f32 %v2688_v52, %v1548_v10  ;;  %2277 = vpow2.f32 %v1567_v8  ;;  %2126 = vmatprep.subr.mxu1 %v1271_v43  ;;  %v2268_v8 = vld [vmem:[%s3045_s9 + $0x10] sm:$0xff]   ;;  %v830_v10 = vld [vmem:[%s613_s18] sm:$0xff] }
 0x13d   : > { %2127 = vmatpush3.msra.mxu1 %v1271_v43 }
 0x13e   : > { %v1571_v17 = vmul.f32 1.442695, %v1561_v13  ;;  %v2269_v13 = vld [vmem:[%s3045_s9 + $0x8] sm:$0xff]  }
 0x13f   : > { %v1552_v18 = vpop.xlane.xlu1 %1551  ;;  %v1550_v21 = vpop.xlane.xlu0 %1549 }
 0x140   : > { %2279 = vpow2.f32 %v1571_v17  ;;  %v1563_v22 = vsub.f32 %v2700_v36, %v1552_v18  ;;  %v1562_v24 = vsub.f32 %v2704_v58, %v1550_v21  ;;  %v832_v17 = vld [vmem:[%s613_s18 + $0x10] sm:$0xff]  ;;  %v2270_v18 = vld [vmem:[%s3045_s9] sm:$0xff]   ;;  %v833_v21 = vld [vmem:[%s613_s18 + $0x18] sm:$0xff] }
 0x142   : > { %v1575_v25 = vmul.f32 1.442695, %v1563_v22  ;;  %v1573_v44 = vmul.f32 1.442695, %v1562_v24  ;;  %v831_v22 = vld [vmem:[%s613_s18 + $0x8] sm:$0xff] }
 0x143   : > { %v1556_v52 = vpop.xlane.xlu1 %1555  ;;  %v1554_v28 = vpop.xlane.xlu0 %1553  ;;  %v835_v24 = vld [vmem:[%s613_s18 + $0x28] sm:$0xff] }
 0x144   : > { %2281 = vpow2.f32 %v1575_v25  ;;  %v1565_v50 = vsub.f32 %v2711_v11, %v1556_v52  ;;  %v1564_v36 = vsub.f32 %v2713_v12, %v1554_v28  ;;  %v1270_v11 = vld [vmem:[%s3048_s12 + $0x60] sm:$0xff] }
 0x145   : > { %2283 = vpow2.f32 %v1573_v44  ;;  %2128 = vmatprep.subr.mxu1 %v1270_v11  ;;  %v834_v25 = vld [vmem:[%s613_s18 + $0x20] sm:$0xff]  ;;  %v837_v44 = vld [vmem:[%s613_s18 + $0x38] sm:$0xff]  ;;  %s2915_s18 = scalar_lea.vmem %s3039_s3, %s2521_s23  ;;  %s582_s23 = sand.u32 1, %s2359_s19  }
 0x146   : > { %v1579_v58 = vmul.f32 1.442695, %v1565_v50  ;;  %v1577_v30 = vmul.f32 1.442695, %v1564_v36  ;;  %2129 = vmatpush3.msra.mxu1 %v1270_v11  ;;  %v2006_v11 = vld [vmem:[%s3049_s13] ss:$0 sm:$0xff] }
 0x147   : > { %v1558_v41 = vpop.xlane.xlu0 %1557  ;;  %2130 = vmatprep.subr.mxu1 %v1269_v39  ;;  %s1963_s20 = sshll.u32 %s582_s23, 6  ;;  %s2996_s22 = scalar_lea.sflag [#allocation3], %s582_s23 }
 0x148   : > { %2285 = vpow2.f32 %v1579_v58  ;;  %v1566_v49 = vsub.f32 %v2718_v14, %v1558_v41  ;;  %v2276_v37 = vpop.eup %2275  ;;  %v2263_v14 = vld [vmem:[%s3045_s9 + $0x38] sm:$0xff]   ;;  %2131 = vmatpush3.msra.mxu1 %v1269_v39  ;;  %s2967_s25 = scalar_lea.vmem [#allocation2], %s1963_s20 }
 0x149   : > { %2287 = vpow2.f32 %v1577_v30  ;;  %v2278_v12 = vpop.eup %2277  ;;  %v2787_v38 = vmul.f32 %v2276_v37, %v2631_v3  ;;  %2132 = vmatprep.subr.mxu1 %v1268_v40  ;;  %2166 = vmatprep.subr.bf16.mxu0 %v2263_v14  ;;  %s1825_s17 = sshll.u32 %s2967_s25, 4  ;;  %s2990_s17 = int_to_ptr.vmem [resolvable:$true] %s1825_s17 }
 0x14a   : > { %v1581_v55 = vmul.f32 1.442695, %v1566_v49  ;;  %v2796_v54 = vmul.f32 %v2278_v12, %v2635_v5  ;;  %2133 = vmatpush3.msra.mxu1 %v1268_v40  ;;  %v1267_v5 = vld [vmem:[%s3048_s12 + $0x48] sm:$0xff]  ;;  %2167 = vmatpush3.bf16.msra.mxu0 %v2263_v14  ;;  %s2307_s29 = scalar_lea.vmem %s2990_s17, 1024 }
 0x14b   : > { %1593 = vadd.xlane.f32.xlu0 %v2787_v38  ;;  %2134 = vmatprep.subr.mxu1 %v1267_v5  ;;  %p2308_p11 = scmp.ne.s32.totalorder %s2990_s17, %s2307_s29 }
 0x14c   : > { %2289 = vpow2.f32 %v1581_v55  ;;  %1591 = vadd.xlane.f32.xlu1 %v2796_v54  ;;  %2135 = vmatpush3.msra.mxu1 %v1267_v5 }
 0x14d   : > { %v2280_v3 = vpop.eup %2279  ;;  %2136 = vmatprep.subr.mxu1 %v1266_v48  ;;  %2168 = vmatprep.subr.bf16.mxu0 %v2264_v45  ;;  %p2309_p12 = pnand %p2308_p11, %p2492_p5 }
 0x14e   : > { %v2804_v42 = vmul.f32 %v2280_v3, %v2647_v15  ;;  %2137 = vmatpush3.msra.mxu1 %v1266_v48  ;;  %2169 = vmatpush3.bf16.msra.mxu0 %v2264_v45 }
 0x14f   : > { %2138 = vmatprep.subr.mxu1 %v1265_v2  ;;  %2170 = vmatprep.subr.bf16.mxu0 %v2265_v60  ;;  %p2310_p13 = pneg %p2309_p12 }
 0x150   : > { %1595 = vadd.xlane.f32.xlu1 %v2804_v42  ;;  %2139 = vmatpush3.msra.mxu1 %v1265_v2 }
 0x151   : > { %v2282_v47 = vpop.eup %2281 }
 0x152   : > { %v2284_v51 = vpop.eup %2283  ;;  %v2814_v15 = vmul.f32 %v2282_v47, %v2659_v26  ;;  %v1264_v26 = vld [vmem:[%s3048_s12 + $0x30] sm:$0xff]  ;;  %2171 = vmatpush3.bf16.msra.mxu0 %v2265_v60 }
 0x153   : > { %v2823_v56 = vmul.f32 %v2284_v51, %v2655_v20  ;;  %2140 = vmatprep.subr.mxu1 %v1264_v26  ;;  %2172 = vmatprep.subr.bf16.mxu0 %v2266_v63 }
 0x154   : > { %1599 = vadd.xlane.f32.xlu1 %v2814_v15  ;;  %2141 = vmatpush3.msra.mxu1 %v1264_v26 }
 0x155   : > { %v2286_v57 = vpop.eup %2285  ;;  %1597 = vadd.xlane.f32.xlu0 %v2823_v56  ;;  %2142 = vmatprep.subr.mxu1 %v1263_v61 }
 0x156   : > { %v2288_v59 = vpop.eup %2287  ;;  %v2831_v1 = vmul.f32 %v2286_v57, %v2690_v53  ;;  %2143 = vmatpush3.msra.mxu1 %v1263_v61  ;;  %2173 = vmatpush3.bf16.msra.mxu0 %v2266_v63 }
 0x157   : > { %v2834_v20 = vmul.f32 %v2288_v59, %v2681_v46  ;;  %v1262_v46 = vld [vmem:[%s3048_s12 + $0x20] sm:$0xff]  ;;  %2174 = vmatprep.subr.bf16.mxu0 %v2267_v4 }
 0x158   : > { %1603 = vadd.xlane.f32.xlu1 %v2831_v1  ;;  %2144 = vmatprep.subr.mxu1 %v1262_v46 }
 0x159   : > { %v2290_v62 = vpop.eup %2289  ;;  %1601 = vadd.xlane.f32.xlu0 %v2834_v20  ;;  %2145 = vmatpush3.msra.mxu1 %v1262_v46 }
 0x15a   : > { %v2848_v53 = vmul.f32 %v2290_v62, %v2707_v6  ;;  %2146 = vmatprep.subr.mxu1 %v1261_v0  ;;  %v1260_v6 = vld [vmem:[%s3048_s12 + $0x10] sm:$0xff]  ;;  %2175 = vmatpush3.bf16.msra.mxu0 %v2267_v4 }
 0x15b   : > { %2147 = vmatpush3.msra.mxu1 %v1261_v0  ;;  %2176 = vmatprep.subr.bf16.mxu0 %v2268_v8 }
 0x15c   : > { %2148 = vmatprep.subr.mxu1 %v1260_v6 }
 0x15d   : > { %1605 = vadd.xlane.f32.xlu0 %v2848_v53  ;;  %2149 = vmatpush3.msra.mxu1 %v1260_v6 }
 0x15e   : > { %2150 = vmatprep.subr.mxu1 %v1259_v7  ;;  %2177 = vmatpush3.bf16.msra.mxu0 %v2268_v8 }
 0x15f   : > { %2151 = vmatpush3.msra.mxu1 %v1259_v7  ;;  %2178 = vmatprep.subr.bf16.mxu0 %v2269_v13 }
 0x160   : > { %2152 = vmatprep.subr.mxu1 %v1258_v9 }
 0x161   : > { %2153 = vmatpush3.msra.mxu1 %v1258_v9 }
 0x162   : > { %2179 = vmatpush3.bf16.msra.mxu0 %v2269_v13 }
 0x163   : > { %2180 = vmatprep.subr.bf16.mxu0 %v2270_v18 }
 0x166   : > { %2181 = vmatpush3.bf16.msra.mxu0 %v2270_v18 }
 0x169   : > { %848 = vperm.xlu1 %2234, %v830_v10  }
 0x16d   : > { %858 = vperm.xlu1 %2234, %v832_v17  }
 0x171   : > { %863 = vperm.xlu1 %2234, %v833_v21  }
 0x173   : > { %853 = vperm.xlu0 %2233, %v831_v22  }
 0x175   : > { %873 = vperm.xlu1 %2234, %v835_v24  }
 0x177   : > { %868 = vperm.xlu0 %2233, %v834_v25  }
 0x179   : > { %883 = vperm.xlu1 %2234, %v837_v44  }
 0x17b   : > { %878 = vperm.xlu0 %2233, %v836_v33  }
 0x1c2   : > { %v2882_v34 = vpop.f32.mrf.mxu1 }
 0x1c4   : > { %v2884_v52 = vpop.f32.mrf.mxu1 }
 0x1ca   : > { %v2886_v28 = vpop.f32.mrf.mxu1 }
 0x1cc   : > { %v2888_v50 = vpop.f32.mrf.mxu1 }
 0x1d2   : > { %v2890_v36 = vpop.f32.mrf.mxu1 }
 0x1d4   : > { %v2892_v58 = vpop.f32.mrf.mxu1  ;;  %v1594_v30 = vpop.xlane.xlu0 %1593 }
 0x1d5   : > { %v1592_v41 = vpop.xlane.xlu1 %1591  ;;  %2291 = vrcp.f32 %v1594_v30 }
 0x1d6   : > { %2293 = vrcp.f32 %v1592_v41 }
 0x1d9   : > { %v1596_v37 = vpop.xlane.xlu1 %1595 }
 0x1da   : > { %v2894_v43 = vpop.f32.mrf.mxu1  ;;  %2295 = vrcp.f32 %v1596_v37 }
 0x1dc   : > { %v2896_v49 = vpop.f32.mrf.mxu1 }
 0x1dd   : > { %v1600_v14 = vpop.xlane.xlu1 %1599 }
 0x1de   : > { %v2112_v12 = vpop.f32.mrf.mxu1  ;;  %v1598_v40 = vpop.xlane.xlu0 %1597 }
 0x1df   : > { %v1217_v55 = vadd.f32 %v2112_v12, %v2006_v11  ;;  %2297 = vrcp.f32 %v1598_v40 }
 0x1e0   : > { %v1211_v39 = vpop.f32.mrf.mxu1  ;;  %2299 = vrcp.f32 %v1600_v14 }
 0x1e1   : > { %v1212_v3 = vadd.f32 %v2006_v11, %v1211_v39  ;;  %v1251_v48 = vmax.f32 %v1217_v55, 0.0  ;;  %v1604_v2 = vpop.xlane.xlu1 %1603 }
 0x1e2   : > { %v2115_v5 = vpop.f32.mrf.mxu1  ;;  %v1602_v57 = vpop.xlane.xlu0 %1601 }
 0x1e3   : > { %v1250_v47 = vmax.f32 %v1212_v3, 0.0  ;;  %v1227_v51 = vadd.f32 %v2115_v5, %v2006_v11  ;;  %v2292_v59 = vpop.eup %2291  ;;  %2301 = vrcp.f32 %v1602_v57 }
 0x1e4   : > { %v1221_v45 = vpop.f32.mrf.mxu1  ;;  %v2294_v61 = vpop.eup %2293  ;;  %v1616_v46 = vmul.f32 %v2292_v59, %v2787_v38  ;;  %2303 = vrcp.f32 %v1604_v2  ;;  %v961_v59 = vld [vmem:[%s2923_s30 + $0x10] sm:$0xff] }
 0x1e5   : > { %v1222_v26 = vadd.f32 %v2006_v11, %v1221_v45  ;;  %2154 = vmatprep.mubr.f32.mxu1 %v1250_v47  ;;  %v1253_v63 = vmax.f32 %v1227_v51, 0.0  ;;  %v1615_v4 = vmul.f32 %v2294_v61, %v2796_v54  ;;  %v849_v3 = vpop.permute.xlu1 %848 }
 0x1e6   : > { %v2118_v60 = vpop.f32.mrf.mxu1  ;;  %2155 = vmatmul.mubr.f32.vlgmr.msra.gmra.mxu1 %v1251_v48  ;;  %v1606_v7 = vpop.xlane.xlu0 %1605  ;;  %v886_v2 = vmul.f32 %v849_v3, %v2721_v16 }
 0x1e7   : > { %v1252_v62 = vmax.f32 %v1222_v26, 0.0  ;;  %v1237_v0 = vadd.f32 %v2118_v60, %v2006_v11  ;;  %2305 = vrcp.f32 %v1606_v7  ;;  %v1623_v10 = vpack.c.bf16 %v1616_v46, %v1615_v4  ;;  %v2296_v38 = vpop.eup %2295  ;;  %v894_v60 = vld [vmem:[%s2915_s18] sm:$0xff]  ;;  %v962_v7 = vld [vmem:[%s2923_s30 + $0x18] sm:$0xff] }
 0x1e8   : > { %v1231_v6 = vpop.f32.mrf.mxu1  ;;  %v1617_v54 = vmul.f32 %v2296_v38, %v2804_v42  ;;  %v902_v4 = vadd.f32 %v894_v60, %v886_v2  ;;  %v965_v38 = vld [vmem:[%s2923_s30 + $0x30] sm:$0xff]  ;;  %v964_v2 = vld [vmem:[%s2923_s30 + $0x28] sm:$0xff] }
 0x1e9   : > { %v1232_v9 = vadd.f32 %v2006_v11, %v1231_v6  ;;  %2157 = vmatprep.mubr.f32.mxu1 %v1252_v62  ;;  %v1255_v17 = vmax.f32 %v1237_v0, 0.0  ;;  %2182 = vmatprep.mubr.bf16.mxu0 %v1623_v10  ;;  %v859_v5 = vpop.permute.xlu1 %858  ;;  %v897_v0 = vld [vmem:[%s2915_s18 + $0x18] sm:$0xff]  ;;  %v1069_v6 = vadd.f32 %v2888_v50, %v961_v59 }
 0x1ea   : > { %v2121_v8 = vpop.f32.mrf.mxu1  ;;  %2158 = vmatmul.mubr.f32.gmra.mxu1 %v1253_v63  ;;  %v959_v63 = vld [vmem:[%s2923_s30] sm:$0xff] }
 0x1eb   : > { %v1254_v13 = vmax.f32 %v1232_v9, 0.0  ;;  %v1247_v18 = vadd.f32 %v2121_v8, %v2006_v11  ;;  %v895_v9 = vld [vmem:[%s2915_s18 + $0x8] sm:$0xff] }
 0x1ec   : > { %v1241_v21 = vpop.f32.mrf.mxu1  ;;  %v2298_v25 = vpop.eup %2297 }
 0x1ed   : > { %v1242_v22 = vadd.f32 %v2006_v11, %v1241_v21  ;;  %2160 = vmatprep.mubr.f32.mxu1 %v1254_v13  ;;  %v1257_v44 = vmax.f32 %v1247_v18, 0.0  ;;  %v1618_v33 = vmul.f32 %v2298_v25, %v2823_v56  ;;  %v2300_v30 = vpop.eup %2299  ;;  %v864_v48 = vpop.permute.xlu1 %863  ;;  %v900_v18 = vld [vmem:[%s2915_s18 + $0x30] sm:$0xff]  ;;  %v898_v25 = vld [vmem:[%s2915_s18 + $0x20] sm:$0xff] }
 0x1ee   : > { %2161 = vmatmul.mubr.f32.gmra.mxu1 %v1255_v17  ;;  %v1619_v55 = vmul.f32 %v2300_v30, %v2814_v15  ;;  %v854_v47 = vpop.permute.xlu0 %853 }
 0x1ef   : > { %v1256_v24 = vmax.f32 %v1242_v22, 0.0  ;;  %v1624_v41 = vpack.c.bf16 %v1618_v33, %v1617_v54  ;;  %v887_v16 = vmul.f32 %v854_v47, %v2724_v19  ;;  %v960_v22 = vld [vmem:[%s2923_s30 + $0x8] sm:$0xff]  ;;  %v1074_v19 = vadd.f32 %v2886_v28, %v962_v7 }
 0x1f0   : > { %v2302_v37 = vpop.eup %2301  ;;  %v1064_v28 = vadd.f32 %v2882_v34, %v960_v22 }
 0x1f1   : > { %2163 = vmatprep.mubr.f32.mxu1 %v1256_v24  ;;  %v2304_v12 = vpop.eup %2303  ;;  %2183 = vmatmul.mubr.bf16.vlgmr.msra.gmra.mxu0 %v1624_v41  ;;  %v1620_v11 = vmul.f32 %v2302_v37, %v2834_v20  ;;  %v874_v57 = vpop.permute.xlu1 %873  ;;  %v903_v24 = vadd.f32 %v895_v9, %v887_v16  ;;  %v963_v41 = vld [vmem:[%s2923_s30 + $0x20] sm:$0xff]  ;;  %v901_v37 = vld [vmem:[%s2915_s18 + $0x38] sm:$0xff] }
 0x1f2   : > { %2164 = vmatmul.mubr.f32.gmra.mxu1 %v1257_v44  ;;  %v1621_v40 = vmul.f32 %v2304_v12, %v2831_v1  ;;  %v869_v15 = vpop.permute.xlu0 %868  ;;  %v888_v1 = vmul.f32 %v859_v5, %v2728_v23  ;;  %v889_v23 = vmul.f32 %v864_v48, %v2733_v27  ;;  %v1059_v27 = vadd.f32 %v2884_v52, %v959_v63 }
 0x1f3   : > { %v1625_v14 = vpack.c.bf16 %v1620_v11, %v1619_v55  ;;  %v890_v50 = vmul.f32 %v869_v15, %v2737_v29  ;;  %v2950_v29 = vld [vmem:[%s3050_s14] ss:$0 sm:$0xff]  ;;  %v1757_v3 = vadd.f32 %v1064_v28, %v903_v24  ;;  %v1079_v48 = vadd.f32 %v2892_v58, %v963_v41 }
 0x1f4   : > { %v2306_v39 = vpop.eup %2305  ;;  %v905_v13 = vadd.f32 %v897_v0, %v889_v23  ;;  %v1084_v63 = vadd.f32 %v2890_v36, %v964_v2 }
 0x1f5   : > { %v1622_v42 = vmul.f32 %v2306_v39, %v2848_v53  ;;  %2186 = vmatprep.mubr.bf16.mxu0 %v1625_v14  ;;  %v896_v53 = vld [vmem:[%s2915_s18 + $0x10] sm:$0xff]  ;;  %v884_v17 = vpop.permute.xlu1 %883  ;;  %v891_v39 = vmul.f32 %v874_v57, %v2741_v31  ;;  %v906_v14 = vadd.f32 %v898_v25, %v890_v50 }
 0x1f6   : > { %v904_v61 = vadd.f32 %v896_v53, %v888_v1  ;;  %v879_v62 = vpop.permute.xlu0 %878  ;;  %v893_v52 = vmul.f32 %v884_v17, %v2753_v35  ;;  %v1759_v55 = vadd.f32 %v1074_v19, %v905_v13  ;;  %v1089_v35 = vadd.f32 %v2896_v49, %v965_v38 }
 0x1f7   : > { %v1626_v56 = vpack.c.bf16 %v1622_v42, %v1621_v40  ;;  %v892_v8 = vmul.f32 %v879_v62, %v2745_v32  ;;  %v1756_v32 = vadd.f32 %v1059_v27, %v902_v4  ;;  %v966_v42 = vld [vmem:[%s2923_s30 + $0x38] sm:$0xff]  ;;  %s2371_s30 = smov [#allocation2]  }
 0x1f8   : > { %v1758_v21 = vadd.f32 %v1069_v6, %v904_v61  ;;  %v909_v15 = vadd.f32 %v901_v37, %v893_v52  ;;  %v1094_v59 = vadd.f32 %v2894_v43, %v966_v42  ;;  %s2311_s16 = sshll.u32 %s2371_s30, 4  ;;  %s2312_s16 = int_to_ptr.vmem [resolvable:$false] %s2311_s16 }
 0x1f9   : > { %2187 = vmatmul.mubr.bf16.gmra.mxu0 %v1626_v56  ;;  %v908_v54 = vadd.f32 %v900_v18, %v892_v8  ;;  %v899_v56 = vld [vmem:[%s2915_s18 + $0x28] sm:$0xff]  ;;  %s2313_s6 = scalar_lea.vmem %s2312_s16, 2048  ;;  %p2314_p0 = scmp.lt.s32.totalorder %s2990_s17, %s2312_s16 }
 0x1fa   : > { %v907_v60 = vadd.f32 %v899_v56, %v891_v39  ;;  %v1763_v0 = vadd.f32 %v1094_v59, %v909_v15  ;;  %p2315_p1 = scmp.lt.s32.totalorder %s2313_s6, %s2307_s29 }
 0x1fb   : > { %v1762_v1 = vadd.f32 %v1089_v35, %v908_v54 }
 0x1fc   : > { %v1761_v9 = vadd.f32 %v1084_v63, %v907_v60  ;;  %p2316_p2 = por %p2315_p1, %p2314_p0 }
 0x1fe   : > { %p2317_p3 = pnand %p2316_p2, %p2310_p13 }
 0x2a6   : > { %v2909_v51 = vpop.f32.mrf.mxu1 }
 0x2a7   : > { %v1765_v49 = vadd.f32 %v2909_v51, %v1757_v3 }
 0x2a8   : > { %v1340_v45 = vpop.f32.mrf.mxu1 }
 0x2a9   : > { %v1764_v12 = vadd.f32 %v1756_v32, %v1340_v45 }
 0x2aa   : > { %v2159_v20 = vpop.f32.mrf.mxu1 }
 0x2ab   : > { %v1767_v5 = vadd.f32 %v2159_v20, %v1759_v55  ;;  %v1760_v20 = vadd.f32 %v1079_v48, %v906_v14 }
 0x2ac   : > { %v1350_v26 = vpop.f32.mrf.mxu1 }
 0x2ad   : > { %v1766_v44 = vadd.f32 %v1758_v21, %v1350_v26 }
 0x2ae   : > { %v2929_v46 = vpop.f32.mrf.mxu1 }
 0x2b0   : > { %v1360_v10 = vpop.f32.mrf.mxu1 }
 0x2b1   : > { %v2184_v30 = vpop.f32.mrf.mxu0  ;;  %v1768_v43 = vadd.f32 %v1760_v20, %v1360_v10  ;;  %v1769_v10 = vadd.f32 %v2929_v46, %v1761_v9 }
 0x2b2   : > { %v2165_v33 = vpop.f32.mrf.mxu1  ;;  %v1774_v11 = vadd.f32 %v2184_v30, %v1766_v44 }
 0x2b3   : > { %v1725_v40 = vpop.f32.mrf.mxu0  ;;  %v1771_v27 = vadd.f32 %v2165_v33, %v1763_v0 }
 0x2b4   : > { %v1789_v34 = vadd.f32 %v2950_v29, %v1774_v11  ;;  %v1772_v47 = vadd.f32 %v1764_v12, %v1725_v40  ;;  %v1370_v45 = vpop.f32.mrf.mxu1 }
 0x2b5   : > { %v2185_v53 = vpop.f32.mrf.mxu0  ;;  %v1770_v58 = vadd.f32 %v1762_v1, %v1370_v45 }
 0x2b6   : > { %v1797_v26 = vmax.f32 %v1789_v34, 0.0  ;;  %v1787_v31 = vadd.f32 %v2950_v29, %v1772_v47  ;;  %v1775_v57 = vadd.f32 %v2185_v53, %v1767_v5 }
 0x2b7   : > { %v1728_v61 = vpop.f32.mrf.mxu0 }
 0x2b8   : > { %1805 = vst [vmem:[%s2967_s25 + $0x10] sm:$0xff] %v1797_v26  ;;  %v1795_v23 = vmax.f32 %v1787_v31, 0.0  ;;  %v1790_v62 = vadd.f32 %v2950_v29, %v1775_v57  ;;  %v1773_v51 = vadd.f32 %v1765_v49, %v1728_v61 }
 0x2b9   : > { %v2188_v6 = vpop.f32.mrf.mxu0 }
 0x2ba   : > { %1803 = vst [vmem:[%s2967_s25] sm:$0xff] %v1795_v23  ;;  %v1798_v4 = vmax.f32 %v1790_v62, 0.0  ;;  %v1788_v16 = vadd.f32 %v2950_v29, %v1773_v51  ;;  %v1778_v7 = vadd.f32 %v2188_v6, %v1770_v58 }
 0x2bb   : > { %v1741_v8 = vpop.f32.mrf.mxu0 }
 0x2bc   : > { %1806 = vst [vmem:[%s2967_s25 + $0x18] sm:$0xff] %v1798_v4  ;;  %v1796_v13 = vmax.f32 %v1788_v16, 0.0  ;;  %v1793_v36 = vadd.f32 %v2950_v29, %v1778_v7  ;;  %v1776_v17 = vadd.f32 %v1768_v43, %v1741_v8 }
 0x2bd   : > { %v2189_v18 = vpop.f32.mrf.mxu0 }
 0x2be   : > { %1804 = vst [vmem:[%s2967_s25 + $0x8] sm:$0xff] %v1796_v13  ;;  %v1801_v21 = vmax.f32 %v1793_v36, 0.0  ;;  %v1791_v22 = vadd.f32 %v2950_v29, %v1776_v17  ;;  %v1779_v50 = vadd.f32 %v2189_v18, %v1771_v27 }
 0x2bf   : > { %v1744_v19 = vpop.f32.mrf.mxu0 }
 0x2c0   : > { %1809 = vst [vmem:[%s2967_s25 + $0x30] sm:$0xff] %v1801_v21  ;;  %v1799_v38 = vmax.f32 %v1791_v22, 0.0  ;;  %v1794_v24 = vadd.f32 %v2950_v29, %v1779_v50  ;;  %v1777_v25 = vadd.f32 %v1769_v10, %v1744_v19 }
 0x2c2   : > { %1807 = vst [vmem:[%s2967_s25 + $0x20] sm:$0xff] %v1799_v38  ;;  %v1802_v32 = vmax.f32 %v1794_v24, 0.0  ;;  %v1792_v46 = vadd.f32 %v2950_v29, %v1777_v25 }
 0x2c4   : > { %1810 = vst [vmem:[%s2967_s25 + $0x38] sm:$0xff] %v1802_v32  ;;  %v1800_v44 = vmax.f32 %v1792_v46, 0.0 }
 0x2c6   : > { %1808 = vst [vmem:[%s2967_s25 + $0x28] sm:$0xff] %v1800_v44 }
 0x2c7   : > { %2320 = shalt.err (!%p2317_p3)
}
 0x2c8   : > { %s2321_s23 = scalar_lea.hbm %s2988_s27, 1024  ;;  %s2325_s26 = scalar_lea.hbm %s3051_s15, 2048 }
 0x2c9   : > { %p2322_p4 = scmp.ne.s32.totalorder %s2988_s27, %s2321_s23  ;;  %p2326_p9 = scmp.lt.s32.totalorder %s2988_s27, %s3051_s15 }
 0x2ca   : > { %p2327_p10 = scmp.lt.s32.totalorder %s2325_s26, %s2321_s23 }
 0x2cb   : > { %p2323_p7 = pnand %p2322_p4, %p2492_p5 }
 0x2cc   : > { %p2328_p11 = por %p2327_p10, %p2326_p9 }
 0x2cd   : > { %p2324_p8 = pneg %p2323_p7 }
 0x2cf   : > { %p2329_p12 = pnand %p2328_p11, %p2324_p8 }
 0x2d1   : > { %2332 = shalt.err (!%p2329_p12)
}
 0x2d2   : > { %s2372_s29 = smov 128   ;;  %s2373_s30 = smov 8  }
 0x2d3   : > { %2190 = dma.vmem_to_hbm [thread:$0]  (%p2492_p5), %s2990_s17, 1024, %s2988_s27, %s2996_s22, %s2372_s29, %s2372_s29, %s2373_s30  }
 0x2d4 PF: > { %s3066_s16 = sld [smem:[#allocation5_spill]]  ;;  %p2196_p13 = scmp.ge.s32.totalorder %s2367_s21, 2 }
 0x2d6   : > { %p2193_p0 = pnand %p2196_p13, %p2496_p6 }
 0x2d8   : > { %p2194_p1 = pneg %p2193_p0 }
 0x2da   : > { %s1840_s20 = sand.u32 1, %s3066_s16  }
 0x2db   : > { %s1841_s23 = scalar_lea.sflag [#allocation3], %s1840_s20 }
 0x2dc   : > { %2350 = dma.done.wait (%p2194_p1), %s1841_s23, 1024  }
 0x2dd   : > { %2352 = vsyncadd (%p2194_p1), %s1841_s23, 4294966272  ;;  %s3068_s21 = sld [smem:[#allocation7_spill]]  ;;  %s3071_s18 = smov %s2359_s19 }
 0x2de   : > { %s3069_s25 = sld [smem:[#allocation6_spill]] }
 0x2df   : > { %s3070_s20 = sld [smem:[#allocation8_spill]] }
 0x2e3   : > { %p25_p2 = scmp.ge.s32.totalorder %s3068_s21, 4  }
 0x2e4   : > { %s3072_s19 = smov %s3069_s25 }
 0x2e5   :  { %27 = sbr.rel (!%p25_p2) target bundleno = 5 (0x5), region = 133 }
 0x2ea   :  { %1846 = vsyncpa [#allocation3], 1 }
 0x2eb   :  { %1848 = vsyncpa [#allocation3 + $0x1], 1 }

// kernel: tpu_custom_call.1
= control target key start
LH: loop header
LB: loop body
LE: loop exit
PB: predicated region body
PF: predicated region fallthrough
CT: control target
= control target key end

     0   :  { %s3036_s0 = inlined_call_operand.vmem [shape: bf16[128,128], index: 0, kind: input, shape index: {}]   ;;  %s3037_s1 = inlined_call_operand.vmem [shape: bf16[128,136], index: 1, kind: input, shape index: {}]   ;;  %s3038_s2 = inlined_call_operand.vmem [shape: f32[128,8], index: 2, kind: input, shape index: {}]   ;;  %s3039_s3 = inlined_call_operand.vmem [shape: f32[128,128], index: 3, kind: input, shape index: {}]   ;;  %s3040_s4 = inlined_call_operand.vmem [shape: f32[128,128], index: 4, kind: input, shape index: {}]   ;;  %s3041_s5 = inlined_call_operand.vmem [shape: f32[128,1], index: 5, kind: input, shape index: {}]   ;;  %s3042_s6 = inlined_call_operand.vmem [shape: f32[128,1], index: 6, kind: input, shape index: {}]   ;;  %s3043_s7 = inlined_call_operand.vmem [shape: f32[128,1], index: 7, kind: input, shape index: {}]   ;;  %s3044_s8 = inlined_call_operand.vmem [shape: f32[1,128], index: 8, kind: input, shape index: {}]   ;;  %s3045_s9 = inlined_call_operand.vmem [shape: bf16[128,128], index: 9, kind: input, shape index: {}]   ;;  %s3046_s10 = inlined_call_operand.vmem [shape: f32[8,128], index: 10, kind: input, shape index: {}]   ;;  %s3047_s11 = inlined_call_operand.vmem [shape: f32[8,128], index: 11, kind: input, shape index: {}]   ;;  %s3048_s12 = inlined_call_operand.vmem [shape: f32[128,128], index: 12, kind: input, shape index: {}]   ;;  %s3049_s13 = inlined_call_operand.vmem [shape: f32[1,128], index: 13, kind: input, shape index: {}]   ;;  %s3050_s14 = inlined_call_operand.vmem [shape: f32[1,128], index: 14, kind: input, shape index: {}]   ;;  %s3051_s15 = inlined_call_operand.hbm [shape: f32[128,128], index: 15, kind: output, shape index: {}]  }
   0x1   :  { %3057 = sst [smem:[#allocation10_spill]] %s3042_s6 }
   0x2   :  { %20 = vsyncpa [#allocation3], 0 }
   0x3   :  { %22 = vsyncpa [#allocation3 + $0x1], 0  ;;  %s2454_s18 = smov 0   ;;  %s2456_s19 = smov 0  }
   0x4   :  { %s2458_s20 = smov 0   ;;  %s2460_s21 = smov 0  }
   0x5 LB: > { %3058 = sst [smem:[#allocation5_spill]] %s2355_s18  ;;  %s2475_s22 = sadd.s32 4294967295, %s2367_s21   ;;  %s2367_s21 = sphi %s2460_s21, %s3068_s21   ;;  %s2363_s20 = sphi %s2458_s20, %s3070_s20   ;;  %s2359_s19 = sphi %s2456_s19, %s3072_s19   ;;  %s2355_s18 = sphi %s2454_s18, %s3071_s18  }
   0x6   : > { %3059 = sst [smem:[#allocation6_spill]] %s2363_s20  ;;  %s1959_s23 = sadd.s32 4294967294, %s2367_s21  }
   0x7   : > { %s2479_s24 = sadd.s32 1, %s2367_s21   ;;  %s385_s25 = sadd.s32 1, %s2363_s20 }
   0x8   : > { %3060 = sst [smem:[#allocation7_spill]] %s2479_s24  ;;  %s382_s26 = ssub.s32 %s2367_s21, %s2479_s24 }
   0x9   : > { %p395_p0 = scmp.ne.s32.totalorder %s2363_s20, %s2359_s19  ;;  %p383_p1 = scmp.eq.s32.totalorder %s382_s26, 0 }
   0xa   : > { %p396_p2 = scmp.eq.s32.totalorder %s2475_s22, 1  ;;  %p401_p3 = scmp.ne.s32.totalorder %s2359_s19, %s2355_s18 }
   0xb   : > { %p402_p4 = scmp.eq.s32.totalorder %s1959_s23, 1  ;;  %p1962_p7 = scmp.ge.s32.totalorder %s2367_s21, 1 }
   0xc   : > { %s2490_s27 = scalar_select %p383_p1, %s2363_s20, %s385_s25  }
   0xd   : > { %p2492_p5 = por %p396_p2, %p395_p0  ;;  %p2496_p6 = por %p402_p4, %p401_p3 }
   0xe   : > { %3061 = sst [smem:[#allocation8_spill]] %s2490_s27  ;;  %p507_p8 = scmp.lt.s32.totalorder %s2367_s21, 3 }
   0xf   : > { %s3063_s29 = scalar_select %p2496_p6, 1, 0 }
  0x10   : > { %p508_p9 = pnand %p1962_p7, %p507_p8 }
  0x11   : > { %3064 = sst [smem:[#allocation9_spill]] %s3063_s29  ;;  %s1964_s17 = sshll.u32 (!%p508_p9), %s2475_s22, 3 }
  0x12   : > { %511 = sbr.rel (%p508_p9) target bundleno = 724 (0x2d4), region = 80  ;;  %p586_p10 = scmp.lt.s32.totalorder (!%p508_p9), %s1964_s17, 15 }
  0x13   : > { %s3065_s6 = sld [smem:[#allocation10_spill]] (!%p508_p9)  ;;  %s2016_s30 = sshll.u32 (!%p508_p9), %s2475_s22, 6 }
  0x14   : > { %s2039_s26 = sshll.u32 (!%p508_p9), %s2475_s22, 10 }
  0x17   : > { %v2235_v0 = vld [vmem:[%s3037_s1 + $0x74] ss:$8 sps:$4 sm:$0xff]   ;;  %v2237_v1 = vld [vmem:[%s3037_s1 + $0x70] ss:$8 sps:$4 sm:$0xff]   ;;  %v2369_v2 = vmov 0   ;;  %s3074_s17 = smov (!%p586_p10, %s1964_s17), 15  ;;  %v1466_v38 = vlaneseq  ;;  %v1478_v42 = vstv %s2016_s30 }
  0x18   : > { %2234 = vset.pattern.permute.xlu1 %v2369_v2  ;;  %2233 = vset.pattern.permute.xlu0 %v2369_v2  ;;  %v2238_v3 = vld [vmem:[%s3037_s1 + $0x64] ss:$8 sps:$4 sm:$0xff]   ;;  %v2240_v4 = vld [vmem:[%s3037_s1 + $0x60] ss:$8 sps:$4 sm:$0xff]   ;;  %s2521_s23 = sshll.u32 %s3074_s17, 3  ;;  %s1965_s29 = sshll.u32 %s3074_s17, 2 }
  0x19   : > { %757 = vmatprep.subr.bf16.mxu0 %v2235_v0  ;;  %789 = vmatprep.mubr.bf16.mxu0 %v2369_v2  ;;  %v2241_v5 = vld [vmem:[%s3037_s1 + $0x54] ss:$8 sps:$4 sm:$0xff]   ;;  %s619_s24 = scalar_lea.vmem %s3065_s6, %s2521_s23  ;;  %v2243_v8 = vld [vmem:[%s3037_s1 + $0x50] ss:$8 sps:$4 sm:$0xff]   ;;  %v2244_v9 = vld [vmem:[%s3037_s1 + $0x44] ss:$8 sps:$4 sm:$0xff]   ;;  %s2552_s27 = scalar_lea.vmem %s3043_s7, %s2521_s23 }
  0x1a   : > { %758 = vmatpush1.bf16.msra.mxu0 %v2237_v1  ;;  %v840_v6 = vld [vmem:[%s619_s24 + $0x10] sm:$0xff]  ;;  %v838_v7 = vld [vmem:[%s619_s24] sm:$0xff]  ;;  %v841_v10 = vld [vmem:[%s619_s24 + $0x18] sm:$0xff]  ;;  %s589_s25 = scalar_lea.vmem %s3036_s0, %s1965_s29  ;;  %v1470_v39 = vshrl.u32 %v1466_v38, 7  ;;  %v2610_v45 = vand.u32 127, %v1466_v38  ;;  %v2370_v58 = vmov 0.0   ;;  %s613_s18 = scalar_lea.vmem %s3041_s5, %s2521_s23 }
  0x1b   : > { %759 = vmatprep.subr.bf16.mxu0 %v2238_v3  ;;  %922 = vperm.xlu1 %2234, %v840_v6   ;;  %v839_v11 = vld [vmem:[%s619_s24 + $0x8] sm:$0xff]  ;;  %v2247_v14 = vld [vmem:[%s3037_s1 + $0x34] ss:$8 sps:$4 sm:$0xff]   ;;  %v842_v15 = vld [vmem:[%s619_s24 + $0x20] sm:$0xff]  ;;  %s2923_s30 = scalar_lea.vmem %s3040_s4, %s2521_s23 }
  0x1c   : > { %912 = vperm.xlu0 %2233, %v838_v7   ;;  %v2246_v12 = vld [vmem:[%s3037_s1 + $0x40] ss:$8 sps:$4 sm:$0xff]   ;;  %v2249_v16 = vld [vmem:[%s3037_s1 + $0x30] ss:$8 sps:$4 sm:$0xff]   ;;  %v2250_v19 = vld [vmem:[%s3037_s1 + $0x24] ss:$8 sps:$4 sm:$0xff]   ;;  %v1479_v48 = vadd.s32 %v1478_v42, %v1470_v39 }
  0x1d   : > { %v843_v13 = vld [vmem:[%s619_s24 + $0x28] sm:$0xff]  ;;  %v845_v17 = vld [vmem:[%s619_s24 + $0x38] sm:$0xff]  ;;  %v844_v18 = vld [vmem:[%s619_s24 + $0x30] sm:$0xff]  ;;  %v1471_v40 = vadd.s32 8, %v1470_v39  ;;  %v1472_v47 = vadd.s32 16, %v1470_v39  ;;  %v1473_v51 = vadd.s32 24, %v1470_v39  ;;  %s595_s24 = scalar_lea.vmem %s3038_s2, %s2521_s23 }
  0x1e   : > { %760 = vmatpush1.bf16.msra.mxu0 %v2240_v4  ;;  %v2252_v20 = vld [vmem:[%s3037_s1 + $0x20] ss:$8 sps:$4 sm:$0xff]   ;;  %v2253_v23 = vld [vmem:[%s3037_s1 + $0x14] ss:$8 sps:$4 sm:$0xff]   ;;  %v2255_v24 = vld [vmem:[%s3037_s1 + $0x10] ss:$8 sps:$4 sm:$0xff]   ;;  %vm1495_vm1 = vcmp.eq.s32.totalorder %v2610_v45, %v1479_v48 }
  0x1f   : > { %761 = vmatprep.subr.bf16.mxu0 %v2241_v5  ;;  %927 = vperm.xlu1 %2234, %v841_v10   ;;  %v1380_v21 = vld [vmem:[%s2552_s27 + $0x8] sm:$0xff]  ;;  %v1379_v22 = vld [vmem:[%s2552_s27] sm:$0xff]  ;;  %v1382_v25 = vld [vmem:[%s2552_s27 + $0x18] sm:$0xff]  ;;  %v1480_v46 = vadd.s32 %v1478_v42, %v1471_v40  ;;  %v1481_v52 = vadd.s32 %v1478_v42, %v1472_v47  ;;  %v1474_v53 = vadd.s32 32, %v1470_v39  ;;  %v1482_v57 = vadd.s32 %v1478_v42, %v1473_v51 }
  0x20   : > { %917 = vperm.xlu0 %2233, %v839_v11   ;;  %v1381_v26 = vld [vmem:[%s2552_s27 + $0x10] sm:$0xff]  ;;  %v2256_v27 = vld [vmem:[%s3037_s1 + $0x4] ss:$8 sps:$4 sm:$0xff]   ;;  %v2258_v28 = vld [vmem:[%s3037_s1] ss:$8 sps:$4 sm:$0xff]   ;;  %v1475_v61 = vadd.s32 40, %v1470_v39 }
  0x21   : > { %v2577_v29 = vld [vmem:[%s589_s25] sm:$0xff]   ;;  %v1384_v30 = vld [vmem:[%s2552_s27 + $0x28] sm:$0xff]  ;;  %v1386_v32 = vld [vmem:[%s2552_s27 + $0x38] sm:$0xff]  ;;  %vm1496_vm0 = vcmp.eq.s32.totalorder %v2610_v45, %v1480_v46  ;;  %v2017_v62 = vsel %vm1495_vm1, 1.0, %v2370_v58  ;;  %vm1497_vm2 = vcmp.eq.s32.totalorder %v2610_v45, %v1481_v52  ;;  %v1483_v63 = vadd.s32 %v1478_v42, %v1474_v53 }
  0x22   : > { %762 = vmatpush1.bf16.msra.mxu0 %v2243_v8  ;;  %v1383_v31 = vld [vmem:[%s2552_s27 + $0x20] sm:$0xff]  ;;  %v1385_v33 = vld [vmem:[%s2552_s27 + $0x30] sm:$0xff]  ;;  %v2585_v34 = vld [vmem:[%s589_s25 + $0x8] sm:$0xff]   ;;  %v1488_v56 = vunpack.c.h.bf16 %v2577_v29  ;;  %v2018_v59 = vsel %vm1496_vm0, 1.0, %v2370_v58  ;;  %v1487_v60 = vunpack.c.l.bf16 %v2577_v29  ;;  %v1476_v0 = vadd.s32 48, %v1470_v39  ;;  %s2988_s27 = scalar_lea.hbm %s3051_s15, %s2039_s26 }
  0x23   : > { %763 = vmatprep.subr.bf16.mxu0 %v2244_v9  ;;  %937 = vperm.xlu1 %2234, %v843_v13   ;;  %v2589_v35 = vld [vmem:[%s589_s25 + $0x10] sm:$0xff]   ;;  %v2593_v36 = vld [vmem:[%s589_s25 + $0x18] sm:$0xff]   ;;  %v958_v37 = vld [vmem:[%s3046_s10] sm:$0xff]  ;;  %v1489_v4 = vunpack.c.l.bf16 %v2585_v34  ;;  %vm1498_vm3 = vcmp.eq.s32.totalorder %v2610_v45, %v1482_v57  ;;  %v2019_v6 = vsel %vm1497_vm2, 1.0, %v2370_v58  ;;  %v1484_v7 = vadd.s32 %v1478_v42, %v1475_v61 }
  0x24   : > { %932 = vperm.xlu0 %2233, %v842_v15   ;;  %2094 = vmatprep.subr.mxu1 %v958_v37  ;;  %v2603_v41 = vld [vmem:[%s3047_s11] sm:$0xff]  ;;  %v2631_v3 = vadd.f32 %v2018_v59, %v1488_v56  ;;  %v2635_v5 = vadd.f32 %v2017_v62, %v1487_v60  ;;  %vm1499_vm4 = vcmp.eq.s32.totalorder %v2610_v45, %v1483_v63  ;;  %v1490_v9 = vunpack.c.h.bf16 %v2585_v34 }
  0x25   : > { %2095 = vmatpush3.msra.mxu1 %v958_v37  ;;  %v2641_v8 = vld [vmem:[%s3044_s8] ss:$0 sm:$0xff]  ;;  %v1485_v10 = vadd.s32 %v1478_v42, %v1476_v0  ;;  %v1477_v11 = vadd.s32 56, %v1470_v39  ;;  %v2647_v15 = vadd.f32 %v2019_v6, %v1489_v4  ;;  %vm1500_vm6 = vcmp.eq.s32.totalorder %v2610_v45, %v1484_v7 }
  0x26   : > { %764 = vmatpush1.bf16.msra.mxu0 %v2246_v12  ;;  %2108 = vmatprep.subr.mxu1 %v2603_v41  ;;  %v2020_v12 = vsel %vm1498_vm3, 1.0, %v2370_v58  ;;  %vm1528_vm5 = vcmp.gt.f32.partialorder %v2631_v3, 0.0  ;;  %vm1527_vm7 = vcmp.gt.f32.partialorder %v2635_v5, 0.0  ;;  %v1493_v37 = vunpack.c.l.bf16 %v2593_v36 }
  0x27   : > { %765 = vmatprep.subr.bf16.mxu0 %v2247_v14  ;;  %947 = vperm.xlu1 %2234, %v845_v17   ;;  %vm1501_vm8 = vcmp.eq.s32.totalorder %v2610_v45, %v1485_v10  ;;  %vm1529_vm11 = vcmp.gt.f32.partialorder %v2647_v15, 0.0 }
  0x28   : > { %942 = vperm.xlu0 %2233, %v844_v18  }
  0x2a   : > { %766 = vmatpush1.bf16.msra.mxu0 %v2249_v16  ;;  %v1491_v16 = vunpack.c.l.bf16 %v2589_v35 }
  0x2b   : > { %767 = vmatprep.subr.bf16.mxu0 %v2250_v19  ;;  %1395 = vperm.xlu1 %2234, %v1380_v21   ;;  %v2021_v19 = vsel %vm1499_vm4, 1.0, %v2370_v58  ;;  %v1486_v21 = vadd.s32 %v1478_v42, %v1477_v11 }
  0x2c   : > { %1390 = vperm.xlu0 %2233, %v1379_v22  }
  0x2d   : > { %vm1502_vm13 = vcmp.eq.s32.totalorder %v2610_v45, %v1486_v21  ;;  %v1494_v45 = vunpack.c.h.bf16 %v2593_v36 }
  0x2e   : > { %768 = vmatpush1.bf16.msra.mxu0 %v2252_v20  ;;  %v2655_v20 = vadd.f32 %v2020_v12, %v1490_v9  ;;  %v2024_v56 = vsel %vm1502_vm13, 1.0, %v2370_v58 }
  0x2f   : > { %769 = vmatprep.subr.bf16.mxu0 %v2253_v23  ;;  %1405 = vperm.xlu1 %2234, %v1382_v25   ;;  %v2707_v6 = vadd.f32 %v2024_v56, %v1494_v45  ;;  %v1101_v45 = vld [vmem:[%s595_s24 + $0x20] sm:$0xff] }
  0x30   : > { %1400 = vperm.xlu0 %2233, %v1381_v26   ;;  %v2659_v26 = vadd.f32 %v2021_v19, %v1491_v16  ;;  %vm1530_vm15 = vcmp.gt.f32.partialorder %v2655_v20, 0.0 }
  0x32   : > { %770 = vmatpush1.bf16.msra.mxu0 %v2255_v24  ;;  %vm1531_vm0 = vcmp.gt.f32.partialorder %v2659_v26, 0.0 }
  0x33   : > { %771 = vmatprep.subr.bf16.mxu0 %v2256_v27  ;;  %1415 = vperm.xlu1 %2234, %v1384_v30   ;;  %v1492_v27 = vunpack.c.h.bf16 %v2589_v35 }
  0x34   : > { %1410 = vperm.xlu0 %2233, %v1383_v31  }
  0x36   : > { %772 = vmatpush1.bf16.msra.mxu0 %v2258_v28  ;;  %v2022_v28 = vsel %vm1500_vm6, 1.0, %v2370_v58 }
  0x37   : > { %1425 = vperm.xlu1 %2234, %v1386_v32   ;;  %v2681_v46 = vadd.f32 %v2022_v28, %v1492_v27 }
  0x38   : > { %1420 = vperm.xlu0 %2233, %v1385_v33  }
  0x39   : > { %790 = vmatmul.mubr.bf16.vlgmr.msra.gmra.mxu0 %v2577_v29  ;;  %vm1532_vm3 = vcmp.gt.f32.partialorder %v2681_v46, 0.0 }
  0x3a   : > { %799 = vmatprep.mubr.bf16.mxu0 %v2369_v2 }
  0x41   : > { %800 = vmatmul.mubr.bf16.gmra.mxu0 %v2585_v34 }
  0x42   : > { %809 = vmatprep.mubr.bf16.mxu0 %v2369_v2 }
  0x49   : > { %810 = vmatmul.mubr.bf16.gmra.mxu0 %v2589_v35  ;;  %v2023_v35 = vsel %vm1501_vm8, 1.0, %v2370_v58  ;;  %vm967_vm8 = vcmask 64512  }
  0x4a   : > { %819 = vmatprep.mubr.bf16.mxu0 %v2369_v2  ;;  %v2690_v53 = vadd.f32 %v2023_v35, %v1493_v37 }
  0x4c   : > { %vm1533_vm4 = vcmp.gt.f32.partialorder %v2690_v53, 0.0 }
  0x51   : > { %820 = vmatmul.mubr.bf16.gmra.mxu0 %v2593_v36 }
  0x96   : > { %v2606_v43 = vpop.permute.xlu1 %922 }
  0x97   : > { %v2608_v44 = vpop.permute.xlu0 %912 }
  0x9a   : > { %v2612_v49 = vpop.permute.xlu1 %927 }
  0x9b   : > { %v2614_v50 = vpop.permute.xlu0 %917 }
  0x9e   : > { %v2618_v54 = vpop.permute.xlu1 %937 }
  0x9f   : > { %v2620_v55 = vpop.permute.xlu0 %932 }
  0xa2   : > { %v2627_v1 = vpop.permute.xlu1 %947 }
  0xa3   : > { %v2629_v2 = vpop.permute.xlu0 %942 }
  0xa6   : > { %v1396_v13 = vpop.permute.xlu1 %1395 }
  0xa7   : > { %v1391_v14 = vpop.permute.xlu0 %1390  ;;  %v1435_v17 = vadd.f32 %v2641_v8, %v1396_v13 }
  0xa8   : > { %v1434_v18 = vadd.f32 %v2641_v8, %v1391_v14 }
  0xa9   : > { %v1451_v22 = vmul.f32 0.2, %v1435_v17  ;;  %vm1443_vm9 = vcmp.gt.f32.partialorder %v1435_v17, 0.0 }
  0xaa   : > { %v1450_v23 = vmul.f32 0.2, %v1434_v18  ;;  %vm1442_vm10 = vcmp.gt.f32.partialorder %v1434_v18, 0.0  ;;  %v1406_v24 = vpop.permute.xlu1 %1405 }
  0xab   : > { %v1401_v25 = vpop.permute.xlu0 %1400  ;;  %v1437_v29 = vadd.f32 %v2641_v8, %v1406_v24  ;;  %v1459_v31 = vsel %vm1443_vm9, %v1435_v17, %v1451_v22 }
  0xac   : > { %v1436_v30 = vadd.f32 %v2641_v8, %v1401_v25  ;;  %v1458_v32 = vsel %vm1442_vm10, %v1434_v18, %v1450_v23  ;;  %v2667_v33 = vsel %vm1528_vm5, %v1459_v31, -1e+30 }
  0xad   : > { %v2671_v34 = vsel %vm1527_vm7, %v1458_v32, -1e+30  ;;  %v1453_v38 = vmul.f32 0.2, %v1437_v29  ;;  %1545 = vmax.xlane.f32.xlu1 %v2667_v33  ;;  %vm1445_vm14 = vcmp.gt.f32.partialorder %v1437_v29, 0.0  ;;  %vm1534_vm7 = vcmp.gt.f32.partialorder %v2707_v6, 0.0 }
  0xae   : > { %v1452_v39 = vmul.f32 0.2, %v1436_v30  ;;  %1543 = vmax.xlane.f32.xlu0 %v2671_v34  ;;  %vm1444_vm12 = vcmp.gt.f32.partialorder %v1436_v30, 0.0  ;;  %v1416_v40 = vpop.permute.xlu1 %1415 }
  0xaf   : > { %v1411_v42 = vpop.permute.xlu0 %1410  ;;  %v1439_v47 = vadd.f32 %v2641_v8, %v1416_v40  ;;  %v1461_v60 = vsel %vm1445_vm14, %v1437_v29, %v1453_v38  ;;  %v1098_v40 = vld [vmem:[%s595_s24 + $0x8] sm:$0xff] }
  0xb0   : > { %v1438_v48 = vadd.f32 %v2641_v8, %v1411_v42  ;;  %v1460_v51 = vsel %vm1444_vm12, %v1436_v30, %v1452_v39  ;;  %v2704_v58 = vsel %vm1530_vm15, %v1461_v60, -1e+30  ;;  %v1099_v42 = vld [vmem:[%s595_s24 + $0x10] sm:$0xff] }
  0xb1   : > { %v2688_v52 = vsel %vm1529_vm11, %v1460_v51, -1e+30  ;;  %v1455_v57 = vmul.f32 0.2, %v1439_v47  ;;  %vm1447_vm2 = vcmp.gt.f32.partialorder %v1439_v47, 0.0  ;;  %v1100_v51 = vld [vmem:[%s595_s24 + $0x18] sm:$0xff] }
  0xb2   : > { %v1454_v59 = vmul.f32 0.2, %v1438_v48  ;;  %1547 = vmax.xlane.f32.xlu0 %v2688_v52  ;;  %vm1446_vm1 = vcmp.gt.f32.partialorder %v1438_v48, 0.0  ;;  %v1426_v61 = vpop.permute.xlu1 %1425 }
  0xb3   : > { %v1421_v62 = vpop.permute.xlu0 %1420  ;;  %v1441_v63 = vadd.f32 %v2641_v8, %v1426_v61  ;;  %v1104_v61 = vld [vmem:[%s595_s24 + $0x38] sm:$0xff] }
  0xb4   : > { %v1440_v0 = vadd.f32 %v2641_v8, %v1421_v62  ;;  %v1462_v4 = vsel %vm1446_vm1, %v1438_v48, %v1454_v59  ;;  %v1463_v8 = vsel %vm1447_vm2, %v1439_v47, %v1455_v57  ;;  %v1102_v57 = vld [vmem:[%s595_s24 + $0x28] sm:$0xff]  ;;  %v1103_v59 = vld [vmem:[%s595_s24 + $0x30] sm:$0xff] }
  0xb5   : > { %v2700_v36 = vsel %vm1531_vm0, %v1462_v4, -1e+30  ;;  %v1457_v7 = vmul.f32 0.2, %v1441_v63  ;;  %vm1449_vm6 = vcmp.gt.f32.partialorder %v1441_v63, 0.0 }
  0xb6   : > { %v1456_v9 = vmul.f32 0.2, %v1440_v0  ;;  %1551 = vmax.xlane.f32.xlu1 %v2700_v36  ;;  %1549 = vmax.xlane.f32.xlu0 %v2704_v58  ;;  %vm1448_vm5 = vcmp.gt.f32.partialorder %v1440_v0, 0.0  ;;  %v2713_v12 = vsel %vm1532_vm3, %v1463_v8, -1e+30 }
  0xb7   : > { %v1465_v13 = vsel %vm1449_vm6, %v1441_v63, %v1457_v7 }
  0xb8   : > { %v1464_v10 = vsel %vm1448_vm5, %v1440_v0, %v1456_v9  ;;  %v2718_v14 = vsel %vm1534_vm7, %v1465_v13, -1e+30 }
  0xb9   : > { %v2711_v11 = vsel %vm1533_vm4, %v1464_v10, -1e+30 }
  0xba   : > { %1555 = vmax.xlane.f32.xlu1 %v2711_v11  ;;  %1553 = vmax.xlane.f32.xlu0 %v2713_v12 }
  0xbe   : > { %1557 = vmax.xlane.f32.xlu0 %v2718_v14 }
  0xf9   : > { %v2721_v16 = vpop.f32.mrf.mxu0 }
  0xfb   : > { %v793_v17 = vpop.f32.mrf.mxu0 }
  0xfc   : > { %v950_v18 = vmul.f32 %v2608_v44, %v793_v17 }
  0xfd   : > { %v2724_v19 = vpop.f32.mrf.mxu0 }
  0xfe   : > { %2096 = vmatprep.mubr.msk.f32.mxu1 %vm967_vm8, %v950_v18 }
  0xff   : > { %v797_v21 = vpop.f32.mrf.mxu0 }
 0x100   : > { %v951_v22 = vmul.f32 %v2614_v50, %v797_v21  ;;  %v1106_v47 = vadd.f32 %v1098_v40, %v797_v21  ;;  %v1268_v40 = vld [vmem:[%s3048_s12 + $0x50] sm:$0xff] }
 0x101   : > { %v2728_v23 = vpop.f32.mrf.mxu0 }
 0x102   : > { %2097 = vmatmul.mubr.msk.f32.vlgmr.msra.gmra.mxu1 %vm967_vm8, %v951_v22 }
 0x103   : > { %v803_v24 = vpop.f32.mrf.mxu0  ;;  %2109 = vmatpush3.msra.mxu1 %v2603_v41 }
 0x104   : > { %v952_v25 = vmul.f32 %v2606_v43, %v803_v24  ;;  %v1107_v48 = vadd.f32 %v1099_v42, %v803_v24 }
 0x105   : > { %v2733_v27 = vpop.f32.mrf.mxu0 }
 0x106   : > { %2099 = vmatprep.mubr.msk.f32.mxu1 %vm967_vm8, %v952_v25 }
 0x107   : > { %v807_v44 = vpop.f32.mrf.mxu0 }
 0x108   : > { %v953_v28 = vmul.f32 %v2612_v49, %v807_v44 }
 0x109   : > { %v2737_v29 = vpop.f32.mrf.mxu0 }
 0x10a   : > { %2100 = vmatmul.mubr.msk.f32.gmra.mxu1 %vm967_vm8, %v953_v28 }
 0x10b   : > { %v813_v50 = vpop.f32.mrf.mxu0 }
 0x10c   : > { %v954_v30 = vmul.f32 %v2620_v55, %v813_v50  ;;  %v1097_v55 = vld [vmem:[%s595_s24] sm:$0xff]  ;;  %v1109_v56 = vadd.f32 %v1101_v45, %v813_v50  ;;  %v2264_v45 = vld [vmem:[%s3045_s9 + $0x30] sm:$0xff]  }
 0x10d   : > { %v2741_v31 = vpop.f32.mrf.mxu0 }
 0x10e   : > { %2102 = vmatprep.mubr.msk.f32.mxu1 %vm967_vm8, %v954_v30 }
 0x10f   : > { %v817_v41 = vpop.f32.mrf.mxu0 }
 0x110   : > { %v955_v43 = vmul.f32 %v2618_v54, %v817_v41  ;;  %v1105_v54 = vadd.f32 %v1097_v55, %v793_v17 }
 0x111   : > { %v2745_v32 = vpop.f32.mrf.mxu0 }
 0x112   : > { %2103 = vmatmul.mubr.msk.f32.gmra.mxu1 %vm967_vm8, %v955_v43  ;;  %v1271_v43 = vld [vmem:[%s3048_s12 + $0x68] sm:$0xff] }
 0x113   : > { %v823_v49 = vpop.f32.mrf.mxu0 }
 0x114   : > { %v956_v37 = vmul.f32 %v2629_v2, %v823_v49  ;;  %v1108_v2 = vadd.f32 %v1100_v51, %v807_v44  ;;  %v1111_v60 = vadd.f32 %v1103_v59, %v823_v49 }
 0x115   : > { %v2753_v35 = vpop.f32.mrf.mxu0 }
 0x116   : > { %2105 = vmatprep.mubr.msk.f32.mxu1 %vm967_vm8, %v956_v37 }
 0x117   : > { %v827_v38 = vpop.f32.mrf.mxu0 }
 0x118   : > { %v957_v39 = vmul.f32 %v2627_v1, %v827_v38  ;;  %v1110_v1 = vadd.f32 %v1102_v57, %v817_v41  ;;  %v1112_v62 = vadd.f32 %v1104_v61, %v827_v38  ;;  %v1263_v61 = vld [vmem:[%s3048_s12 + $0x28] sm:$0xff] }
 0x11a   : > { %2106 = vmatmul.mubr.msk.f32.gmra.mxu1 %vm967_vm8, %v957_v39  ;;  %v1269_v39 = vld [vmem:[%s3048_s12 + $0x58] sm:$0xff] }
 0x11b   : > { %2110 = vmatprep.mubr.msk.f32.mxu1 %vm967_vm8, %v1105_v54 }
 0x11e   : > { %2111 = vmatmul.mubr.msk.f32.vlgmr.msra.gmra.mxu1 %vm967_vm8, %v1106_v47 }
 0x11f   : > { %2113 = vmatprep.mubr.msk.f32.mxu1 %vm967_vm8, %v1107_v48  ;;  %v1266_v48 = vld [vmem:[%s3048_s12 + $0x40] sm:$0xff] }
 0x122   : > { %2114 = vmatmul.mubr.msk.f32.gmra.mxu1 %vm967_vm8, %v1108_v2  ;;  %v1265_v2 = vld [vmem:[%s3048_s12 + $0x38] sm:$0xff] }
 0x123   : > { %2116 = vmatprep.mubr.msk.f32.mxu1 %vm967_vm8, %v1109_v56 }
 0x126   : > { %2117 = vmatmul.mubr.msk.f32.gmra.mxu1 %vm967_vm8, %v1110_v1 }
 0x127   : > { %2119 = vmatprep.mubr.msk.f32.mxu1 %vm967_vm8, %v1111_v60  ;;  %v2265_v60 = vld [vmem:[%s3045_s9 + $0x28] sm:$0xff]  }
 0x12a   : > { %2120 = vmatmul.mubr.msk.f32.gmra.mxu1 %vm967_vm8, %v1112_v62 }
 0x136   : > { %v1546_v63 = vpop.xlane.xlu1 %1545 }
 0x137   : > { %v1544_v0 = vpop.xlane.xlu0 %1543  ;;  %v1560_v4 = vsub.f32 %v2667_v33, %v1546_v63  ;;  %v1273_v33 = vld [vmem:[%s3048_s12 + $0x78] sm:$0xff]  ;;  %v2266_v63 = vld [vmem:[%s3045_s9 + $0x20] sm:$0xff]  }
 0x138   : > { %v1559_v7 = vsub.f32 %v2671_v34, %v1544_v0  ;;  %v1272_v34 = vld [vmem:[%s3048_s12 + $0x70] sm:$0xff]  ;;  %2122 = vmatprep.subr.mxu1 %v1273_v33  ;;  %v1261_v0 = vld [vmem:[%s3048_s12 + $0x18] sm:$0xff] }
 0x139   : > { %v1569_v9 = vmul.f32 1.442695, %v1560_v4  ;;  %2123 = vmatpush3.msra.mxu1 %v1273_v33  ;;  %v2267_v4 = vld [vmem:[%s3045_s9 + $0x18] sm:$0xff]   ;;  %v836_v33 = vld [vmem:[%s613_s18 + $0x30] sm:$0xff] }
 0x13a   : > { %v1567_v8 = vmul.f32 1.442695, %v1559_v7  ;;  %2124 = vmatprep.subr.mxu1 %v1272_v34  ;;  %v1259_v7 = vld [vmem:[%s3048_s12 + $0x8] sm:$0xff] }
 0x13b   : > { %v1548_v10 = vpop.xlane.xlu0 %1547  ;;  %2275 = vpow2.f32 %v1569_v9  ;;  %2125 = vmatpush3.msra.mxu1 %v1272_v34  ;;  %v1258_v9 = vld [vmem:[%s3048_s12] sm:$0xff] }
 0x13c   : > { %v1561_v13 = vsub.f32 %v2688_v52, %v1548_v10  ;;  %2277 = vpow2.f32 %v1567_v8  ;;  %2126 = vmatprep.subr.mxu1 %v1271_v43  ;;  %v2268_v8 = vld [vmem:[%s3045_s9 + $0x10] sm:$0xff]   ;;  %v830_v10 = vld [vmem:[%s613_s18] sm:$0xff] }
 0x13d   : > { %2127 = vmatpush3.msra.mxu1 %v1271_v43 }
 0x13e   : > { %v1571_v17 = vmul.f32 1.442695, %v1561_v13  ;;  %v2269_v13 = vld [vmem:[%s3045_s9 + $0x8] sm:$0xff]  }
 0x13f   : > { %v1552_v18 = vpop.xlane.xlu1 %1551  ;;  %v1550_v21 = vpop.xlane.xlu0 %1549 }
 0x140   : > { %2279 = vpow2.f32 %v1571_v17  ;;  %v1563_v22 = vsub.f32 %v2700_v36, %v1552_v18  ;;  %v1562_v24 = vsub.f32 %v2704_v58, %v1550_v21  ;;  %v832_v17 = vld [vmem:[%s613_s18 + $0x10] sm:$0xff]  ;;  %v2270_v18 = vld [vmem:[%s3045_s9] sm:$0xff]   ;;  %v833_v21 = vld [vmem:[%s613_s18 + $0x18] sm:$0xff] }
 0x142   : > { %v1575_v25 = vmul.f32 1.442695, %v1563_v22  ;;  %v1573_v44 = vmul.f32 1.442695, %v1562_v24  ;;  %v831_v22 = vld [vmem:[%s613_s18 + $0x8] sm:$0xff] }
 0x143   : > { %v1556_v52 = vpop.xlane.xlu1 %1555  ;;  %v1554_v28 = vpop.xlane.xlu0 %1553  ;;  %v835_v24 = vld [vmem:[%s613_s18 + $0x28] sm:$0xff] }
 0x144   : > { %2281 = vpow2.f32 %v1575_v25  ;;  %v1565_v50 = vsub.f32 %v2711_v11, %v1556_v52  ;;  %v1564_v36 = vsub.f32 %v2713_v12, %v1554_v28  ;;  %v1270_v11 = vld [vmem:[%s3048_s12 + $0x60] sm:$0xff] }
 0x145   : > { %2283 = vpow2.f32 %v1573_v44  ;;  %2128 = vmatprep.subr.mxu1 %v1270_v11  ;;  %v834_v25 = vld [vmem:[%s613_s18 + $0x20] sm:$0xff]  ;;  %v837_v44 = vld [vmem:[%s613_s18 + $0x38] sm:$0xff]  ;;  %s2915_s18 = scalar_lea.vmem %s3039_s3, %s2521_s23  ;;  %s582_s23 = sand.u32 1, %s2359_s19  }
 0x146   : > { %v1579_v58 = vmul.f32 1.442695, %v1565_v50  ;;  %v1577_v30 = vmul.f32 1.442695, %v1564_v36  ;;  %2129 = vmatpush3.msra.mxu1 %v1270_v11  ;;  %v2006_v11 = vld [vmem:[%s3049_s13] ss:$0 sm:$0xff] }
 0x147   : > { %v1558_v41 = vpop.xlane.xlu0 %1557  ;;  %2130 = vmatprep.subr.mxu1 %v1269_v39  ;;  %s1963_s20 = sshll.u32 %s582_s23, 6  ;;  %s2996_s22 = scalar_lea.sflag [#allocation3], %s582_s23 }
 0x148   : > { %2285 = vpow2.f32 %v1579_v58  ;;  %v1566_v49 = vsub.f32 %v2718_v14, %v1558_v41  ;;  %v2276_v37 = vpop.eup %2275  ;;  %v2263_v14 = vld [vmem:[%s3045_s9 + $0x38] sm:$0xff]   ;;  %2131 = vmatpush3.msra.mxu1 %v1269_v39  ;;  %s2967_s25 = scalar_lea.vmem [#allocation2], %s1963_s20 }
 0x149   : > { %2287 = vpow2.f32 %v1577_v30  ;;  %v2278_v12 = vpop.eup %2277  ;;  %v2787_v38 = vmul.f32 %v2276_v37, %v2631_v3  ;;  %2132 = vmatprep.subr.mxu1 %v1268_v40  ;;  %2166 = vmatprep.subr.bf16.mxu0 %v2263_v14  ;;  %s1825_s17 = sshll.u32 %s2967_s25, 4  ;;  %s2990_s17 = int_to_ptr.vmem [resolvable:$true] %s1825_s17 }
 0x14a   : > { %v1581_v55 = vmul.f32 1.442695, %v1566_v49  ;;  %v2796_v54 = vmul.f32 %v2278_v12, %v2635_v5  ;;  %2133 = vmatpush3.msra.mxu1 %v1268_v40  ;;  %v1267_v5 = vld [vmem:[%s3048_s12 + $0x48] sm:$0xff]  ;;  %2167 = vmatpush3.bf16.msra.mxu0 %v2263_v14  ;;  %s2307_s29 = scalar_lea.vmem %s2990_s17, 1024 }
 0x14b   : > { %1593 = vadd.xlane.f32.xlu0 %v2787_v38  ;;  %2134 = vmatprep.subr.mxu1 %v1267_v5  ;;  %p2308_p11 = scmp.ne.s32.totalorder %s2990_s17, %s2307_s29 }
 0x14c   : > { %2289 = vpow2.f32 %v1581_v55  ;;  %1591 = vadd.xlane.f32.xlu1 %v2796_v54  ;;  %2135 = vmatpush3.msra.mxu1 %v1267_v5 }
 0x14d   : > { %v2280_v3 = vpop.eup %2279  ;;  %2136 = vmatprep.subr.mxu1 %v1266_v48  ;;  %2168 = vmatprep.subr.bf16.mxu0 %v2264_v45  ;;  %p2309_p12 = pnand %p2308_p11, %p2492_p5 }
 0x14e   : > { %v2804_v42 = vmul.f32 %v2280_v3, %v2647_v15  ;;  %2137 = vmatpush3.msra.mxu1 %v1266_v48  ;;  %2169 = vmatpush3.bf16.msra.mxu0 %v2264_v45 }
 0x14f   : > { %2138 = vmatprep.subr.mxu1 %v1265_v2  ;;  %2170 = vmatprep.subr.bf16.mxu0 %v2265_v60  ;;  %p2310_p13 = pneg %p2309_p12 }
 0x150   : > { %1595 = vadd.xlane.f32.xlu1 %v2804_v42  ;;  %2139 = vmatpush3.msra.mxu1 %v1265_v2 }
 0x151   : > { %v2282_v47 = vpop.eup %2281 }
 0x152   : > { %v2284_v51 = vpop.eup %2283  ;;  %v2814_v15 = vmul.f32 %v2282_v47, %v2659_v26  ;;  %v1264_v26 = vld [vmem:[%s3048_s12 + $0x30] sm:$0xff]  ;;  %2171 = vmatpush3.bf16.msra.mxu0 %v2265_v60 }
 0x153   : > { %v2823_v56 = vmul.f32 %v2284_v51, %v2655_v20  ;;  %2140 = vmatprep.subr.mxu1 %v1264_v26  ;;  %2172 = vmatprep.subr.bf16.mxu0 %v2266_v63 }
 0x154   : > { %1599 = vadd.xlane.f32.xlu1 %v2814_v15  ;;  %2141 = vmatpush3.msra.mxu1 %v1264_v26 }
 0x155   : > { %v2286_v57 = vpop.eup %2285  ;;  %1597 = vadd.xlane.f32.xlu0 %v2823_v56  ;;  %2142 = vmatprep.subr.mxu1 %v1263_v61 }
 0x156   : > { %v2288_v59 = vpop.eup %2287  ;;  %v2831_v1 = vmul.f32 %v2286_v57, %v2690_v53  ;;  %2143 = vmatpush3.msra.mxu1 %v1263_v61  ;;  %2173 = vmatpush3.bf16.msra.mxu0 %v2266_v63 }
 0x157   : > { %v2834_v20 = vmul.f32 %v2288_v59, %v2681_v46  ;;  %v1262_v46 = vld [vmem:[%s3048_s12 + $0x20] sm:$0xff]  ;;  %2174 = vmatprep.subr.bf16.mxu0 %v2267_v4 }
 0x158   : > { %1603 = vadd.xlane.f32.xlu1 %v2831_v1  ;;  %2144 = vmatprep.subr.mxu1 %v1262_v46 }
 0x159   : > { %v2290_v62 = vpop.eup %2289  ;;  %1601 = vadd.xlane.f32.xlu0 %v2834_v20  ;;  %2145 = vmatpush3.msra.mxu1 %v1262_v46 }
 0x15a   : > { %v2848_v53 = vmul.f32 %v2290_v62, %v2707_v6  ;;  %2146 = vmatprep.subr.mxu1 %v1261_v0  ;;  %v1260_v6 = vld [vmem:[%s3048_s12 + $0x10] sm:$0xff]  ;;  %2175 = vmatpush3.bf16.msra.mxu0 %v2267_v4 }
 0x15b   : > { %2147 = vmatpush3.msra.mxu1 %v1261_v0  ;;  %2176 = vmatprep.subr.bf16.mxu0 %v2268_v8 }
 0x15c   : > { %2148 = vmatprep.subr.mxu1 %v1260_v6 }
 0x15d   : > { %1605 = vadd.xlane.f32.xlu0 %v2848_v53  ;;  %2149 = vmatpush3.msra.mxu1 %v1260_v6 }
 0x15e   : > { %2150 = vmatprep.subr.mxu1 %v1259_v7  ;;  %2177 = vmatpush3.bf16.msra.mxu0 %v2268_v8 }
 0x15f   : > { %2151 = vmatpush3.msra.mxu1 %v1259_v7  ;;  %2178 = vmatprep.subr.bf16.mxu0 %v2269_v13 }
 0x160   : > { %2152 = vmatprep.subr.mxu1 %v1258_v9 }
 0x161   : > { %2153 = vmatpush3.msra.mxu1 %v1258_v9 }
 0x162   : > { %2179 = vmatpush3.bf16.msra.mxu0 %v2269_v13 }
 0x163   : > { %2180 = vmatprep.subr.bf16.mxu0 %v2270_v18 }
 0x166   : > { %2181 = vmatpush3.bf16.msra.mxu0 %v2270_v18 }
 0x169   : > { %848 = vperm.xlu1 %2234, %v830_v10  }
 0x16d   : > { %858 = vperm.xlu1 %2234, %v832_v17  }
 0x171   : > { %863 = vperm.xlu1 %2234, %v833_v21  }
 0x173   : > { %853 = vperm.xlu0 %2233, %v831_v22  }
 0x175   : > { %873 = vperm.xlu1 %2234, %v835_v24  }
 0x177   : > { %868 = vperm.xlu0 %2233, %v834_v25  }
 0x179   : > { %883 = vperm.xlu1 %2234, %v837_v44  }
 0x17b   : > { %878 = vperm.xlu0 %2233, %v836_v33  }
 0x1c2   : > { %v2882_v34 = vpop.f32.mrf.mxu1 }
 0x1c4   : > { %v2884_v52 = vpop.f32.mrf.mxu1 }
 0x1ca   : > { %v2886_v28 = vpop.f32.mrf.mxu1 }
 0x1cc   : > { %v2888_v50 = vpop.f32.mrf.mxu1 }
 0x1d2   : > { %v2890_v36 = vpop.f32.mrf.mxu1 }
 0x1d4   : > { %v2892_v58 = vpop.f32.mrf.mxu1  ;;  %v1594_v30 = vpop.xlane.xlu0 %1593 }
 0x1d5   : > { %v1592_v41 = vpop.xlane.xlu1 %1591  ;;  %2291 = vrcp.f32 %v1594_v30 }
 0x1d6   : > { %2293 = vrcp.f32 %v1592_v41 }
 0x1d9   : > { %v1596_v37 = vpop.xlane.xlu1 %1595 }
 0x1da   : > { %v2894_v43 = vpop.f32.mrf.mxu1  ;;  %2295 = vrcp.f32 %v1596_v37 }
 0x1dc   : > { %v2896_v49 = vpop.f32.mrf.mxu1 }
 0x1dd   : > { %v1600_v14 = vpop.xlane.xlu1 %1599 }
 0x1de   : > { %v2112_v12 = vpop.f32.mrf.mxu1  ;;  %v1598_v40 = vpop.xlane.xlu0 %1597 }
 0x1df   : > { %v1217_v55 = vadd.f32 %v2112_v12, %v2006_v11  ;;  %2297 = vrcp.f32 %v1598_v40 }
 0x1e0   : > { %v1211_v39 = vpop.f32.mrf.mxu1  ;;  %2299 = vrcp.f32 %v1600_v14 }
 0x1e1   : > { %v1212_v3 = vadd.f32 %v2006_v11, %v1211_v39  ;;  %v1251_v48 = vmax.f32 %v1217_v55, 0.0  ;;  %v1604_v2 = vpop.xlane.xlu1 %1603 }
 0x1e2   : > { %v2115_v5 = vpop.f32.mrf.mxu1  ;;  %v1602_v57 = vpop.xlane.xlu0 %1601 }
 0x1e3   : > { %v1250_v47 = vmax.f32 %v1212_v3, 0.0  ;;  %v1227_v51 = vadd.f32 %v2115_v5, %v2006_v11  ;;  %v2292_v59 = vpop.eup %2291  ;;  %2301 = vrcp.f32 %v1602_v57 }
 0x1e4   : > { %v1221_v45 = vpop.f32.mrf.mxu1  ;;  %v2294_v61 = vpop.eup %2293  ;;  %v1616_v46 = vmul.f32 %v2292_v59, %v2787_v38  ;;  %2303 = vrcp.f32 %v1604_v2  ;;  %v961_v59 = vld [vmem:[%s2923_s30 + $0x10] sm:$0xff] }
 0x1e5   : > { %v1222_v26 = vadd.f32 %v2006_v11, %v1221_v45  ;;  %2154 = vmatprep.mubr.f32.mxu1 %v1250_v47  ;;  %v1253_v63 = vmax.f32 %v1227_v51, 0.0  ;;  %v1615_v4 = vmul.f32 %v2294_v61, %v2796_v54  ;;  %v849_v3 = vpop.permute.xlu1 %848 }
 0x1e6   : > { %v2118_v60 = vpop.f32.mrf.mxu1  ;;  %2155 = vmatmul.mubr.f32.vlgmr.msra.gmra.mxu1 %v1251_v48  ;;  %v1606_v7 = vpop.xlane.xlu0 %1605  ;;  %v886_v2 = vmul.f32 %v849_v3, %v2721_v16 }
 0x1e7   : > { %v1252_v62 = vmax.f32 %v1222_v26, 0.0  ;;  %v1237_v0 = vadd.f32 %v2118_v60, %v2006_v11  ;;  %2305 = vrcp.f32 %v1606_v7  ;;  %v1623_v10 = vpack.c.bf16 %v1616_v46, %v1615_v4  ;;  %v2296_v38 = vpop.eup %2295  ;;  %v894_v60 = vld [vmem:[%s2915_s18] sm:$0xff]  ;;  %v962_v7 = vld [vmem:[%s2923_s30 + $0x18] sm:$0xff] }
 0x1e8   : > { %v1231_v6 = vpop.f32.mrf.mxu1  ;;  %v1617_v54 = vmul.f32 %v2296_v38, %v2804_v42  ;;  %v902_v4 = vadd.f32 %v894_v60, %v886_v2  ;;  %v965_v38 = vld [vmem:[%s2923_s30 + $0x30] sm:$0xff]  ;;  %v964_v2 = vld [vmem:[%s2923_s30 + $0x28] sm:$0xff] }
 0x1e9   : > { %v1232_v9 = vadd.f32 %v2006_v11, %v1231_v6  ;;  %2157 = vmatprep.mubr.f32.mxu1 %v1252_v62  ;;  %v1255_v17 = vmax.f32 %v1237_v0, 0.0  ;;  %2182 = vmatprep.mubr.bf16.mxu0 %v1623_v10  ;;  %v859_v5 = vpop.permute.xlu1 %858  ;;  %v897_v0 = vld [vmem:[%s2915_s18 + $0x18] sm:$0xff]  ;;  %v1069_v6 = vadd.f32 %v2888_v50, %v961_v59 }
 0x1ea   : > { %v2121_v8 = vpop.f32.mrf.mxu1  ;;  %2158 = vmatmul.mubr.f32.gmra.mxu1 %v1253_v63  ;;  %v959_v63 = vld [vmem:[%s2923_s30] sm:$0xff] }
 0x1eb   : > { %v1254_v13 = vmax.f32 %v1232_v9, 0.0  ;;  %v1247_v18 = vadd.f32 %v2121_v8, %v2006_v11  ;;  %v895_v9 = vld [vmem:[%s2915_s18 + $0x8] sm:$0xff] }
 0x1ec   : > { %v1241_v21 = vpop.f32.mrf.mxu1  ;;  %v2298_v25 = vpop.eup %2297 }
 0x1ed   : > { %v1242_v22 = vadd.f32 %v2006_v11, %v1241_v21  ;;  %2160 = vmatprep.mubr.f32.mxu1 %v1254_v13  ;;  %v1257_v44 = vmax.f32 %v1247_v18, 0.0  ;;  %v1618_v33 = vmul.f32 %v2298_v25, %v2823_v56  ;;  %v2300_v30 = vpop.eup %2299  ;;  %v864_v48 = vpop.permute.xlu1 %863  ;;  %v900_v18 = vld [vmem:[%s2915_s18 + $0x30] sm:$0xff]  ;;  %v898_v25 = vld [vmem:[%s2915_s18 + $0x20] sm:$0xff] }
 0x1ee   : > { %2161 = vmatmul.mubr.f32.gmra.mxu1 %v1255_v17  ;;  %v1619_v55 = vmul.f32 %v2300_v30, %v2814_v15  ;;  %v854_v47 = vpop.permute.xlu0 %853 }
 0x1ef   : > { %v1256_v24 = vmax.f32 %v1242_v22, 0.0  ;;  %v1624_v41 = vpack.c.bf16 %v1618_v33, %v1617_v54  ;;  %v887_v16 = vmul.f32 %v854_v47, %v2724_v19  ;;  %v960_v22 = vld [vmem:[%s2923_s30 + $0x8] sm:$0xff]  ;;  %v1074_v19 = vadd.f32 %v2886_v28, %v962_v7 }
 0x1f0   : > { %v2302_v37 = vpop.eup %2301  ;;  %v1064_v28 = vadd.f32 %v2882_v34, %v960_v22 }
 0x1f1   : > { %2163 = vmatprep.mubr.f32.mxu1 %v1256_v24  ;;  %v2304_v12 = vpop.eup %2303  ;;  %2183 = vmatmul.mubr.bf16.vlgmr.msra.gmra.mxu0 %v1624_v41  ;;  %v1620_v11 = vmul.f32 %v2302_v37, %v2834_v20  ;;  %v874_v57 = vpop.permute.xlu1 %873  ;;  %v903_v24 = vadd.f32 %v895_v9, %v887_v16  ;;  %v963_v41 = vld [vmem:[%s2923_s30 + $0x20] sm:$0xff]  ;;  %v901_v37 = vld [vmem:[%s2915_s18 + $0x38] sm:$0xff] }
 0x1f2   : > { %2164 = vmatmul.mubr.f32.gmra.mxu1 %v1257_v44  ;;  %v1621_v40 = vmul.f32 %v2304_v12, %v2831_v1  ;;  %v869_v15 = vpop.permute.xlu0 %868  ;;  %v888_v1 = vmul.f32 %v859_v5, %v2728_v23  ;;  %v889_v23 = vmul.f32 %v864_v48, %v2733_v27  ;;  %v1059_v27 = vadd.f32 %v2884_v52, %v959_v63 }
 0x1f3   : > { %v1625_v14 = vpack.c.bf16 %v1620_v11, %v1619_v55  ;;  %v890_v50 = vmul.f32 %v869_v15, %v2737_v29  ;;  %v2950_v29 = vld [vmem:[%s3050_s14] ss:$0 sm:$0xff]  ;;  %v1757_v3 = vadd.f32 %v1064_v28, %v903_v24  ;;  %v1079_v48 = vadd.f32 %v2892_v58, %v963_v41 }
 0x1f4   : > { %v2306_v39 = vpop.eup %2305  ;;  %v905_v13 = vadd.f32 %v897_v0, %v889_v23  ;;  %v1084_v63 = vadd.f32 %v2890_v36, %v964_v2 }
 0x1f5   : > { %v1622_v42 = vmul.f32 %v2306_v39, %v2848_v53  ;;  %2186 = vmatprep.mubr.bf16.mxu0 %v1625_v14  ;;  %v896_v53 = vld [vmem:[%s2915_s18 + $0x10] sm:$0xff]  ;;  %v884_v17 = vpop.permute.xlu1 %883  ;;  %v891_v39 = vmul.f32 %v874_v57, %v2741_v31  ;;  %v906_v14 = vadd.f32 %v898_v25, %v890_v50 }
 0x1f6   : > { %v904_v61 = vadd.f32 %v896_v53, %v888_v1  ;;  %v879_v62 = vpop.permute.xlu0 %878  ;;  %v893_v52 = vmul.f32 %v884_v17, %v2753_v35  ;;  %v1759_v55 = vadd.f32 %v1074_v19, %v905_v13  ;;  %v1089_v35 = vadd.f32 %v2896_v49, %v965_v38 }
 0x1f7   : > { %v1626_v56 = vpack.c.bf16 %v1622_v42, %v1621_v40  ;;  %v892_v8 = vmul.f32 %v879_v62, %v2745_v32  ;;  %v1756_v32 = vadd.f32 %v1059_v27, %v902_v4  ;;  %v966_v42 = vld [vmem:[%s2923_s30 + $0x38] sm:$0xff]  ;;  %s2371_s30 = smov [#allocation2]  }
 0x1f8   : > { %v1758_v21 = vadd.f32 %v1069_v6, %v904_v61  ;;  %v909_v15 = vadd.f32 %v901_v37, %v893_v52  ;;  %v1094_v59 = vadd.f32 %v2894_v43, %v966_v42  ;;  %s2311_s16 = sshll.u32 %s2371_s30, 4  ;;  %s2312_s16 = int_to_ptr.vmem [resolvable:$false] %s2311_s16 }
 0x1f9   : > { %2187 = vmatmul.mubr.bf16.gmra.mxu0 %v1626_v56  ;;  %v908_v54 = vadd.f32 %v900_v18, %v892_v8  ;;  %v899_v56 = vld [vmem:[%s2915_s18 + $0x28] sm:$0xff]  ;;  %s2313_s6 = scalar_lea.vmem %s2312_s16, 2048  ;;  %p2314_p0 = scmp.lt.s32.totalorder %s2990_s17, %s2312_s16 }
 0x1fa   : > { %v907_v60 = vadd.f32 %v899_v56, %v891_v39  ;;  %v1763_v0 = vadd.f32 %v1094_v59, %v909_v15  ;;  %p2315_p1 = scmp.lt.s32.totalorder %s2313_s6, %s2307_s29 }
 0x1fb   : > { %v1762_v1 = vadd.f32 %v1089_v35, %v908_v54 }
 0x1fc   : > { %v1761_v9 = vadd.f32 %v1084_v63, %v907_v60  ;;  %p2316_p2 = por %p2315_p1, %p2314_p0 }
 0x1fe   : > { %p2317_p3 = pnand %p2316_p2, %p2310_p13 }
 0x2a6   : > { %v2909_v51 = vpop.f32.mrf.mxu1 }
 0x2a7   : > { %v1765_v49 = vadd.f32 %v2909_v51, %v1757_v3 }
 0x2a8   : > { %v1340_v45 = vpop.f32.mrf.mxu1 }
 0x2a9   : > { %v1764_v12 = vadd.f32 %v1756_v32, %v1340_v45 }
 0x2aa   : > { %v2159_v20 = vpop.f32.mrf.mxu1 }
 0x2ab   : > { %v1767_v5 = vadd.f32 %v2159_v20, %v1759_v55  ;;  %v1760_v20 = vadd.f32 %v1079_v48, %v906_v14 }
 0x2ac   : > { %v1350_v26 = vpop.f32.mrf.mxu1 }
 0x2ad   : > { %v1766_v44 = vadd.f32 %v1758_v21, %v1350_v26 }
 0x2ae   : > { %v2929_v46 = vpop.f32.mrf.mxu1 }
 0x2b0   : > { %v1360_v10 = vpop.f32.mrf.mxu1 }
 0x2b1   : > { %v2184_v30 = vpop.f32.mrf.mxu0  ;;  %v1768_v43 = vadd.f32 %v1760_v20, %v1360_v10  ;;  %v1769_v10 = vadd.f32 %v2929_v46, %v1761_v9 }
 0x2b2   : > { %v2165_v33 = vpop.f32.mrf.mxu1  ;;  %v1774_v11 = vadd.f32 %v2184_v30, %v1766_v44 }
 0x2b3   : > { %v1725_v40 = vpop.f32.mrf.mxu0  ;;  %v1771_v27 = vadd.f32 %v2165_v33, %v1763_v0 }
 0x2b4   : > { %v1789_v34 = vadd.f32 %v2950_v29, %v1774_v11  ;;  %v1772_v47 = vadd.f32 %v1764_v12, %v1725_v40  ;;  %v1370_v45 = vpop.f32.mrf.mxu1 }
 0x2b5   : > { %v2185_v53 = vpop.f32.mrf.mxu0  ;;  %v1770_v58 = vadd.f32 %v1762_v1, %v1370_v45 }
 0x2b6   : > { %v1797_v26 = vmax.f32 %v1789_v34, 0.0  ;;  %v1787_v31 = vadd.f32 %v2950_v29, %v1772_v47  ;;  %v1775_v57 = vadd.f32 %v2185_v53, %v1767_v5 }
 0x2b7   : > { %v1728_v61 = vpop.f32.mrf.mxu0 }
 0x2b8   : > { %1805 = vst [vmem:[%s2967_s25 + $0x10] sm:$0xff] %v1797_v26  ;;  %v1795_v23 = vmax.f32 %v1787_v31, 0.0  ;;  %v1790_v62 = vadd.f32 %v2950_v29, %v1775_v57  ;;  %v1773_v51 = vadd.f32 %v1765_v49, %v1728_v61 }
 0x2b9   : > { %v2188_v6 = vpop.f32.mrf.mxu0 }
 0x2ba   : > { %1803 = vst [vmem:[%s2967_s25] sm:$0xff] %v1795_v23  ;;  %v1798_v4 = vmax.f32 %v1790_v62, 0.0  ;;  %v1788_v16 = vadd.f32 %v2950_v29, %v1773_v51  ;;  %v1778_v7 = vadd.f32 %v2188_v6, %v1770_v58 }
 0x2bb   : > { %v1741_v8 = vpop.f32.mrf.mxu0 }
 0x2bc   : > { %1806 = vst [vmem:[%s2967_s25 + $0x18] sm:$0xff] %v1798_v4  ;;  %v1796_v13 = vmax.f32 %v1788_v16, 0.0  ;;  %v1793_v36 = vadd.f32 %v2950_v29, %v1778_v7  ;;  %v1776_v17 = vadd.f32 %v1768_v43, %v1741_v8 }
 0x2bd   : > { %v2189_v18 = vpop.f32.mrf.mxu0 }
 0x2be   : > { %1804 = vst [vmem:[%s2967_s25 + $0x8] sm:$0xff] %v1796_v13  ;;  %v1801_v21 = vmax.f32 %v1793_v36, 0.0  ;;  %v1791_v22 = vadd.f32 %v2950_v29, %v1776_v17  ;;  %v1779_v50 = vadd.f32 %v2189_v18, %v1771_v27 }
 0x2bf   : > { %v1744_v19 = vpop.f32.mrf.mxu0 }
 0x2c0   : > { %1809 = vst [vmem:[%s2967_s25 + $0x30] sm:$0xff] %v1801_v21  ;;  %v1799_v38 = vmax.f32 %v1791_v22, 0.0  ;;  %v1794_v24 = vadd.f32 %v2950_v29, %v1779_v50  ;;  %v1777_v25 = vadd.f32 %v1769_v10, %v1744_v19 }
 0x2c2   : > { %1807 = vst [vmem:[%s2967_s25 + $0x20] sm:$0xff] %v1799_v38  ;;  %v1802_v32 = vmax.f32 %v1794_v24, 0.0  ;;  %v1792_v46 = vadd.f32 %v2950_v29, %v1777_v25 }
 0x2c4   : > { %1810 = vst [vmem:[%s2967_s25 + $0x38] sm:$0xff] %v1802_v32  ;;  %v1800_v44 = vmax.f32 %v1792_v46, 0.0 }
 0x2c6   : > { %1808 = vst [vmem:[%s2967_s25 + $0x28] sm:$0xff] %v1800_v44 }
 0x2c7   : > { %2320 = shalt.err (!%p2317_p3)
}
 0x2c8   : > { %s2321_s23 = scalar_lea.hbm %s2988_s27, 1024  ;;  %s2325_s26 = scalar_lea.hbm %s3051_s15, 2048 }
 0x2c9   : > { %p2322_p4 = scmp.ne.s32.totalorder %s2988_s27, %s2321_s23  ;;  %p2326_p9 = scmp.lt.s32.totalorder %s2988_s27, %s3051_s15 }
 0x2ca   : > { %p2327_p10 = scmp.lt.s32.totalorder %s2325_s26, %s2321_s23 }
 0x2cb   : > { %p2323_p7 = pnand %p2322_p4, %p2492_p5 }
 0x2cc   : > { %p2328_p11 = por %p2327_p10, %p2326_p9 }
 0x2cd   : > { %p2324_p8 = pneg %p2323_p7 }
 0x2cf   : > { %p2329_p12 = pnand %p2328_p11, %p2324_p8 }
 0x2d1   : > { %2332 = shalt.err (!%p2329_p12)
}
 0x2d2   : > { %s2372_s29 = smov 128   ;;  %s2373_s30 = smov 8  }
 0x2d3   : > { %2190 = dma.vmem_to_hbm [thread:$0]  (%p2492_p5), %s2990_s17, 1024, %s2988_s27, %s2996_s22, %s2372_s29, %s2372_s29, %s2373_s30  }
 0x2d4 PF: > { %s3066_s16 = sld [smem:[#allocation5_spill]]  ;;  %p2196_p13 = scmp.ge.s32.totalorder %s2367_s21, 2 }
 0x2d6   : > { %p2193_p0 = pnand %p2196_p13, %p2496_p6 }
 0x2d8   : > { %p2194_p1 = pneg %p2193_p0 }
 0x2da   : > { %s1840_s20 = sand.u32 1, %s3066_s16  }
 0x2db   : > { %s1841_s23 = scalar_lea.sflag [#allocation3], %s1840_s20 }
 0x2dc   : > { %2350 = dma.done.wait (%p2194_p1), %s1841_s23, 1024  }
 0x2dd   : > { %2352 = vsyncadd (%p2194_p1), %s1841_s23, 4294966272  ;;  %s3068_s21 = sld [smem:[#allocation7_spill]]  ;;  %s3071_s18 = smov %s2359_s19 }
 0x2de   : > { %s3069_s25 = sld [smem:[#allocation6_spill]] }
 0x2df   : > { %s3070_s20 = sld [smem:[#allocation8_spill]] }
 0x2e3   : > { %p25_p2 = scmp.ge.s32.totalorder %s3068_s21, 4  }
 0x2e4   : > { %s3072_s19 = smov %s3069_s25 }
 0x2e5   :  { %27 = sbr.rel (!%p25_p2) target bundleno = 5 (0x5), region = 133 }
 0x2ea   :  { %1846 = vsyncpa [#allocation3], 1 }
 0x2eb   :  { %1848 = vsyncpa [#allocation3 + $0x1], 1 }

</bundles_post_ra>
